<compile_context>
chip_gen: v5e
topology: v5e:2x2
jax: 0.10.0
libtpu: 0.0.40
codegen_flags: <defaults>
</compile_context>

<pallas_src>
import functools

import jax
import jax.numpy as jnp
from jax.experimental import pallas as pl
from jax.experimental.pallas import tpu as pltpu

_EPS = 1e-5      # torch.nn.BatchNorm1d default eps
_LANES = 128     # TPU vreg lane width
_SUBL = 16       # slab row-slot alignment (covers bf16 (16,128) and f32 (8,128))


def _round_up(v, m):
  return -(-v // m) * m


# ------------------------------ fused kernel -----------------------------------

def _graphsage_fused_kernel(x_ref, adj_ref, w_ref, s_ref, o_ref, *,
                            w_layout, s_layout, nb_hidden_layers, bn,
                            inv_count, mm_dtype):
  """Whole GraphSAGEMLP forward; every intermediate stays in VMEM/vregs."""

  def weight(name):                         # mm-dtype weight slice (static offsets)
    r, k, c = w_layout[name]
    return w_ref[r:r + k, :c]

  def bias(name):                           # (1, c) f32 row
    r, c = s_layout[name]
    return s_ref[r:r + 1, :c]

  def proj(name):                           # f32 projector block
    r, k, c = s_layout[name]
    return s_ref[r:r + k, :c]

  def mm(a, b):                             # MXU matmul, f32 accumulation
    return jnp.dot(a, b, preferred_element_type=jnp.float32)

  lo = lambda a: a.astype(mm_dtype)         # one cast per use-site, reused

  adj = adj_ref[...]                        # (N, N) row-normalised, mm_dtype

  # ---- encoder MLP (per node) --------------------------------------------------
  z = jnp.maximum(mm(x_ref[...], weight("enc_w1")) + bias("enc_b1"), 0.0)
  z = mm(lo(z), weight("enc_w2")) + bias("enc_b2")            # (N, F) f32

  if bn:
    expand = proj("expand")                 # (H, F*H): per-channel -> per-lane
    fold = proj("fold")                     # (F*H, H): per-lane  -> per-channel

  def sage(h, name, bname):
    # PyG SAGEConv(aggr='mean'): lin_l(mean_agg) + lin_r(h); bias folded in.
    h_lo = lo(h)                            # single cast, reused for both matmuls
    if (name + "_wlr") in w_layout:         # fused form: one MXU matmul / one pop
      agg_lo = lo(mm(adj, h_lo))            # neighbour mean over nodes
      r = mm(jnp.concatenate([agg_lo, h_lo], axis=-1), weight(name + "_wlr"))
    else:                                   # split form, reordered for live ranges
      r = mm(h_lo, weight(name + "_wr"))
      agg_lo = lo(mm(adj, h_lo))
      r = r + mm(agg_lo, weight(name + "_wl"))
    return r + bias(bname)

  def bn_relu(h, i):
    if not bn:
      return jnp.maximum(h, 0.0)
    # BatchNorm1d(track_running_stats=False): batch stats over all N*F rows per
    # channel, f32 one-pass; fold matmuls and expand matmuls batched 4 -> 2.
    stats = jnp.concatenate([jnp.sum(h, axis=0, keepdims=True),
                             jnp.sum(h * h, axis=0, keepdims=True)], axis=0)
    folded = mm(stats, fold) * inv_count                      # (2, H): [mean, E[x^2]]
    mean = folded[0:1]
    # TODO(synk): for trained params / real data with |mean| >> std, switch to a
    #             mean-shifted (or two-pass) variance to avoid cancellation.
    var = jnp.maximum(folded[1:2] - mean * mean, 0.0)
    scale = bias("bn_g%d" % i) * jax.lax.rsqrt(var + _EPS)    # (1, H)
    shift = bias("bn_b%d" % i) - mean * scale
    aff = mm(jnp.concatenate([scale, shift], axis=0), expand)  # (2, F*H)
    return jnp.maximum(h * aff[0:1] + aff[1:2], 0.0)

  # ---- SAGE stack ----------------------------------------------------------------
  h = bn_relu(sage(z, "in", "in_b"), 0)                       # (N, F*H)
  # TODO(synk): switch to lax.fori_loop + dynamic slab offsets if
  #             nb_hidden_layers grows beyond a handful of layers.
  for i in range(nb_hidden_layers - 1):
    h = bn_relu(sage(h, "hid%d" % i, "hid_b%d" % i), i + 1)
  h = sage(h, "out", "out_b")                                 # (N, F*dec_in)

  # ---- decoder MLP ---------------------------------------------------------------
  h = jnp.maximum(mm(lo(h), weight("dec_w1")) + bias("dec_b1"), 0.0)
  h = mm(lo(h), weight("dec_w2")) + bias("dec_b2")            # (N, out_pad) lane-dense
  o_ref[...] = h


# ----------------------- one-time parameter packing -----------------------------

def prepare_graphsage(params, *, nb_hidden_layers, mm_dtype=jnp.bfloat16):
  """Pack all weights into 2 slabs ONCE (outside the per-call path)."""
  f = params["enc_w2"].shape[1]            # feature slots after the encoder
  hdim = params["in_wl"].shape[1]          # size_hidden_layers
  dec_in, dec_hidden = params["dec_w1"].shape
  d2 = params["dec_w2"].shape[1]           # model output channels
  n_hid = nb_hidden_layers - 1
  out_pad = _round_up(f * d2, _LANES)      # always lane-dense output store

  eye_f = jnp.eye(f, dtype=jnp.float32)
  widen = lambda w: jnp.kron(eye_f, jnp.asarray(w, jnp.float32))
  wide_b = lambda b: jnp.tile(jnp.asarray(b, jnp.float32).reshape(1, -1), (1, f))

  # --- mm-dtype weight slab -------------------------------------------------------
  fuse = (f * hdim) % _LANES == 0          # lane-concat offset must stay 128-aligned
  w_list = [("enc_w1", jnp.asarray(params["enc_w1"], jnp.float32)),
            ("enc_w2", jnp.asarray(params["enc_w2"], jnp.float32)),
            ("in_wl", widen(params["in_wl"])),   # in-layer kept split (tiny K)
            ("in_wr", widen(params["in_wr"]))]

  def add_sage(name, wl, wr):
    if fuse:
      w_list.append((name + "_wlr", jnp.concatenate([widen(wl), widen(wr)], axis=0)))
    else:
      w_list.append((name + "_wl", widen(wl)))
      w_list.append((name + "_wr", widen(wr)))

  for i in range(n_hid):
    add_sage("hid%d" % i, params["hid_wl"][i], params["hid_wr"][i])
  add_sage("out", params["out_wl"], params["out_wr"])
  w_list.append(("dec_w1", widen(params["dec_w1"])))
  w_list.append(("dec_w2", jnp.pad(widen(params["dec_w2"]),
                                   ((0, 0), (0, out_pad - f * d2)))))

  wcols = _round_up(max(w.shape[1] for _, w in w_list), _LANES)
  w_layout, row = {}, 0
  for name, w in w_list:
    w_layout[name] = (row, w.shape[0], w.shape[1])
    row += _round_up(w.shape[0], _SUBL)
  w_slab = jnp.zeros((_round_up(row, _SUBL), wcols), jnp.float32)
  for name, w in w_list:
    r, k, c = w_layout[name]
    w_slab = w_slab.at[r:r + k, :c].set(w)
  w_slab = w_slab.astype(mm_dtype)

  # --- f32 bias / BN / projector slab ----------------------------------------------
  s_list = [("enc_b1", jnp.asarray(params["enc_b1"], jnp.float32).reshape(1, -1)),
            ("enc_b2", jnp.asarray(params["enc_b2"], jnp.float32).reshape(1, -1)),
            ("in_b", wide_b(params["in_b"]))]
  for i in range(n_hid):
    s_list.append(("hid_b%d" % i, wide_b(params["hid_b"][i])))
  s_list += [("out_b", wide_b(params["out_b"])),
             ("dec_b1", wide_b(params["dec_b1"])),
             ("dec_b2", jnp.pad(wide_b(params["dec_b2"]),
                                ((0, 0), (0, out_pad - f * d2))))]
  for i in range(nb_hidden_layers):
    s_list.append(("bn_g%d" % i,
                   jnp.asarray(params["bn_gamma"][i], jnp.float32).reshape(1, -1)))
    s_list.append(("bn_b%d" % i,
                   jnp.asarray(params["bn_beta"][i], jnp.float32).reshape(1, -1)))

  # 0/1 projectors (exact in f32) for the slot-major / channel-minor wide layout.
  expand = jnp.kron(jnp.ones((1, f), jnp.float32), jnp.eye(hdim, dtype=jnp.float32))
  fold = expand.T

  s_layout, srow = {}, 0
  for name, v in s_list:
    s_layout[name] = (srow, v.shape[1])
    srow += 1
  srow = _round_up(srow, 8)
  s_layout["expand"] = (srow, hdim, f * hdim)
  srow += _round_up(hdim, 8)
  s_layout["fold"] = (srow, f * hdim, hdim)
  srow += _round_up(f * hdim, 8)

  scols = _round_up(max([f * hdim] + [v.shape[1] for _, v in s_list]), _LANES)
  s_slab = jnp.zeros((_round_up(srow, 8), scols), jnp.float32)
  for name, v in s_list:
    r, c = s_layout[name]
    s_slab = s_slab.at[r:r + 1, :c].set(v)
  r, k, c = s_layout["expand"]
  s_slab = s_slab.at[r:r + k, :c].set(expand)
  r, k, c = s_layout["fold"]
  s_slab = s_slab.at[r:r + k, :c].set(fold)

  meta = dict(f=f, d2=d2, out_pad=out_pad, w_layout=w_layout, s_layout=s_layout)
  return w_slab, s_slab, meta


# ------------------------------ per-call forward --------------------------------

def make_graphsage_forward(params, *, nb_hidden_layers, bn_bool=True,
                           mm_dtype=jnp.bfloat16):
  w_slab, s_slab, meta = prepare_graphsage(
      params, nb_hidden_layers=nb_hidden_layers, mm_dtype=mm_dtype)
  f, d2, out_pad = meta["f"], meta["d2"], meta["out_pad"]

  def forward(x, adj, w_slab, s_slab):
    n = x.shape[0]
    kernel = functools.partial(
        _graphsage_fused_kernel,
        w_layout=meta["w_layout"], s_layout=meta["s_layout"],
        nb_hidden_layers=nb_hidden_layers, bn=bn_bool,
        inv_count=1.0 / float(n * f), mm_dtype=mm_dtype)
    vmem = pl.BlockSpec(memory_space=pltpu.MemorySpace.VMEM)
    # TODO(synk): for large N, tile the dense adjacency over node-row blocks with
    #             a BlockSpec grid (rows "parallel", neighbour blocks "arbitrary")
    #             and set vmem_limit_bytes — required on v7x (64 MiB VMEM) once N
    #             reaches a few thousand.
    # TODO(synk): on v7x at production sizes, split the F feature slots across the
    #             2 TensorCores (only BN needs a tiny cross-core stats exchange);
    #             not worth it at N=64.
    out_wide = pl.pallas_call(
        kernel,
        out_shape=jax.ShapeDtypeStruct((n, out_pad), jnp.float32),
        in_specs=[vmem, vmem, vmem, vmem],
        out_specs=vmem,
    )(x.astype(mm_dtype), adj.astype(mm_dtype), w_slab, s_slab)
    return out_wide[:, :f * d2].reshape(n, f, d2)

  fwd = jax.jit(forward)
  return lambda x, adj: fwd(x, adj, w_slab, s_slab)


# --------------------------- parameters & reference ------------------------------

def init_params(key, *, in_dim, enc_hidden, enc_out, hidden, nb_hidden_layers,
                dec_in, dec_hidden, out_dim):
  ks = iter(jax.random.split(key, 64))

  def w(shape, scale=0.1):
    return scale * jax.random.normal(next(ks), shape, jnp.float32)

  return {
      "enc_w1": w((in_dim, enc_hidden)), "enc_b1": w((enc_hidden,)),
      "enc_w2": w((enc_hidden, enc_out)), "enc_b2": w((enc_out,)),
      "in_wl": w((1, hidden)), "in_wr": w((1, hidden)), "in_b": w((hidden,)),
      "hid_wl": [w((hidden, hidden)) for _ in range(nb_hidden_layers - 1)],
      "hid_wr": [w((hidden, hidden)) for _ in range(nb_hidden_layers - 1)],
      "hid_b": [w((hidden,)) for _ in range(nb_hidden_layers - 1)],
      "out_wl": w((hidden, dec_in)), "out_wr": w((hidden, dec_in)),
      "out_b": w((dec_in,)),
      "bn_gamma": [jnp.ones((hidden,), jnp.float32) for _ in range(nb_hidden_layers)],
      "bn_beta": [jnp.zeros((hidden,), jnp.float32) for _ in range(nb_hidden_layers)],
      "dec_w1": w((dec_in, dec_hidden)), "dec_b1": w((dec_hidden,)),
      "dec_w2": w((dec_hidden, out_dim)), "dec_b2": w((out_dim,)),
  }


def reference_forward(params, x, adj, *, nb_hidden_layers, bn_bool=True):
  hp = jax.lax.Precision.HIGHEST

  def lin(v, w, b, act):
    y = jnp.dot(v, w, precision=hp) + b
    return jnp.maximum(y, 0.0) if act else y

  z = lin(lin(x, params["enc_w1"], params["enc_b1"], True),
          params["enc_w2"], params["enc_b2"], False)
  n, f = z.shape
  z = z.reshape(n, f, 1)

  def sage(v, wl, wr, b):
    agg = jnp.einsum("nm,mfc->nfc", adj, v, precision=hp)
    return (jnp.einsum("nfc,ch->nfh", agg, wl, precision=hp)
            + jnp.einsum("nfc,ch->nfh", v, wr, precision=hp) + b)

  def bn_relu(v, g, bta, do_bn):
    if do_bn:
      mean = v.mean(axis=(0, 1), keepdims=True)
      var = ((v - mean) ** 2).mean(axis=(0, 1), keepdims=True)
      v = (v - mean) / jnp.sqrt(var + _EPS) * g + bta
    return jnp.maximum(v, 0.0)

  z = bn_relu(sage(z, params["in_wl"], params["in_wr"], params["in_b"]),
              params["bn_gamma"][0], params["bn_beta"][0], bn_bool)
  for i in range(nb_hidden_layers - 1):
    z = bn_relu(sage(z, params["hid_wl"][i], params["hid_wr"][i], params["hid_b"][i]),
                params["bn_gamma"][i + 1], params["bn_beta"][i + 1], bn_bool)
  z = sage(z, params["out_wl"], params["out_wr"], params["out_b"])
  n, f, c = z.shape
  z2 = lin(lin(z.reshape(n * f, c), params["dec_w1"], params["dec_b1"], True),
           params["dec_w2"], params["dec_b2"], False)
  return z2.reshape(n, f, -1)


# ------------------------------------ main ----------------------------------------

if __name__ == "__main__":
  N, IN_DIM, E = 64, 4, 256
  hparams = dict(nb_hidden_layers=2, size_hidden_layers=32, bn_bool=True,
                 encoder=[IN_DIM, 16, 8], decoder=[4, 16, 3])

  key = jax.random.PRNGKey(0)
  kx, ke, kp = jax.random.split(key, 3)
  x = jax.random.normal(kx, (N, IN_DIM), jnp.float32)
  edge_index = jax.random.randint(ke, (2, E), 0, N)

  # dense row-normalised adjacency == SAGEConv 'mean' neighbour aggregation
  adj = jnp.zeros((N, N), jnp.float32).at[edge_index[1], edge_index[0]].add(1.0)
  deg = jnp.clip(adj.sum(axis=1, keepdims=True), 1.0, None)
  adj = adj / deg

  params = init_params(
      kp, in_dim=IN_DIM, enc_hidden=hparams["encoder"][1],
      enc_out=hparams["encoder"][2], hidden=hparams["size_hidden_layers"],
      nb_hidden_layers=hparams["nb_hidden_layers"],
      dec_in=hparams["decoder"][0], dec_hidden=hparams["decoder"][1],
      out_dim=hparams["decoder"][2])

  # all widening/packing happens here, ONCE (not in the per-call path)
  fwd_bf16 = make_graphsage_forward(
      params, nb_hidden_layers=hparams["nb_hidden_layers"],
      bn_bool=hparams["bn_bool"], mm_dtype=jnp.bfloat16)      # perf default
  fwd_f32 = make_graphsage_forward(
      params, nb_hidden_layers=hparams["nb_hidden_layers"],
      bn_bool=hparams["bn_bool"], mm_dtype=jnp.float32)       # correctness-check only

  out = jax.block_until_ready(fwd_bf16(x, adj))
  out_f32 = jax.block_until_ready(fwd_f32(x, adj))

  ref = reference_forward(params, x, adj,
                          nb_hidden_layers=hparams["nb_hidden_layers"],
                          bn_bool=hparams["bn_bool"])

  assert out.shape == (N, hparams["encoder"][2], hparams["decoder"][-1]), out.shape
  err_f32 = float(jnp.abs(out_f32 - ref).max())
  assert jnp.allclose(out_f32, ref, rtol=1e-3, atol=1e-3), err_f32
  err_bf16 = float(jnp.abs(out - ref).max())
  assert jnp.allclose(out, ref, rtol=5e-2, atol=5e-2), err_bf16
  print("KERNEL_OK")
</pallas_src>

<mosaic_0001>
module attributes {stable_mosaic.version = 11 : i64} {
  func.func @_graphsage_fused_kernel(%arg0: memref<64x4xbf16, #tpu.memory_space<vmem>>, %arg1: memref<64x64xbf16, #tpu.memory_space<vmem>>, %arg2: memref<1248x256xbf16, #tpu.memory_space<vmem>>, %arg3: memref<304x256xf32, #tpu.memory_space<vmem>>, %arg4: memref<64x128xf32, #tpu.memory_space<vmem>>) attributes {dimension_semantics = [], scalar_prefetch = 0 : i64, scratch_operands = 0 : i64, tpu.core_type = #tpu.core_type<tc>} {
    %c0 = arith.constant 0 : index
    %c0_0 = arith.constant 0 : index
    %0 = vector.load %arg1[%c0, %c0_0] : memref<64x64xbf16, #tpu.memory_space<vmem>>, vector<64x64xbf16>
    %c0_1 = arith.constant 0 : index
    %c0_2 = arith.constant 0 : index
    %1 = vector.load %arg0[%c0_1, %c0_2] : memref<64x4xbf16, #tpu.memory_space<vmem>>, vector<64x4xbf16>
    %c0_3 = arith.constant 0 : index
    %c0_4 = arith.constant 0 : index
    %2 = vector.load %arg2[%c0_3, %c0_4] : memref<1248x256xbf16, #tpu.memory_space<vmem>>, vector<4x16xbf16>
    %cst = arith.constant dense<0.000000e+00> : vector<64x16xf32>
    %3 = tpu.matmul %1, %2, %cst {dimension_numbers = #tpu.dot_dimension_numbers<[1], [0], [0], [1], [0, 0, 1, 1], [], []>} : vector<64x4xbf16>, vector<4x16xbf16>, vector<64x16xf32> -> vector<64x16xf32>
    %c0_5 = arith.constant 0 : index
    %c0_6 = arith.constant 0 : index
    %4 = vector.load %arg3[%c0_5, %c0_6] : memref<304x256xf32, #tpu.memory_space<vmem>>, vector<1x16xf32>
    %5 = vector.broadcast %4 : vector<1x16xf32> to vector<64x16xf32>
    %6 = arith.addf %3, %5 : vector<64x16xf32>
    %cst_7 = arith.constant 0.000000e+00 : f32
    %7 = vector.broadcast %cst_7 : f32 to vector<64x16xf32>
    %8 = arith.maximumf %6, %7 : vector<64x16xf32>
    %9 = arith.truncf %8 : vector<64x16xf32> to vector<64x16xbf16>
    %c16 = arith.constant 16 : index
    %c0_8 = arith.constant 0 : index
    %10 = vector.load %arg2[%c16, %c0_8] : memref<1248x256xbf16, #tpu.memory_space<vmem>>, vector<16x8xbf16>
    %cst_9 = arith.constant dense<0.000000e+00> : vector<64x8xf32>
    %11 = tpu.matmul %9, %10, %cst_9 {dimension_numbers = #tpu.dot_dimension_numbers<[1], [0], [0], [1], [0, 0, 1, 1], [], []>} : vector<64x16xbf16>, vector<16x8xbf16>, vector<64x8xf32> -> vector<64x8xf32>
    %c1 = arith.constant 1 : index
    %c0_10 = arith.constant 0 : index
    %12 = vector.load %arg3[%c1, %c0_10] : memref<304x256xf32, #tpu.memory_space<vmem>>, vector<1x8xf32>
    %13 = vector.broadcast %12 : vector<1x8xf32> to vector<64x8xf32>
    %14 = arith.addf %11, %13 : vector<64x8xf32>
    %c16_11 = arith.constant 16 : index
    %c0_12 = arith.constant 0 : index
    %15 = vector.load %arg3[%c16_11, %c0_12] : memref<304x256xf32, #tpu.memory_space<vmem>>, vector<32x256xf32>
    %c48 = arith.constant 48 : index
    %c0_13 = arith.constant 0 : index
    %16 = vector.load %arg3[%c48, %c0_13] : memref<304x256xf32, #tpu.memory_space<vmem>>, vector<256x32xf32>
    %17 = arith.truncf %14 : vector<64x8xf32> to vector<64x8xbf16>
    %c48_14 = arith.constant 48 : index
    %c0_15 = arith.constant 0 : index
    %18 = vector.load %arg2[%c48_14, %c0_15] : memref<1248x256xbf16, #tpu.memory_space<vmem>>, vector<8x256xbf16>
    %cst_16 = arith.constant dense<0.000000e+00> : vector<64x256xf32>
    %19 = tpu.matmul %17, %18, %cst_16 {dimension_numbers = #tpu.dot_dimension_numbers<[1], [0], [0], [1], [0, 0, 1, 1], [], []>} : vector<64x8xbf16>, vector<8x256xbf16>, vector<64x256xf32> -> vector<64x256xf32>
    %cst_17 = arith.constant dense<0.000000e+00> : vector<64x8xf32>
    %20 = tpu.matmul %0, %17, %cst_17 {dimension_numbers = #tpu.dot_dimension_numbers<[1], [0], [0], [1], [0, 0, 1, 1], [], []>} : vector<64x64xbf16>, vector<64x8xbf16>, vector<64x8xf32> -> vector<64x8xf32>
    %21 = arith.truncf %20 : vector<64x8xf32> to vector<64x8xbf16>
    %c32 = arith.constant 32 : index
    %c0_18 = arith.constant 0 : index
    %22 = vector.load %arg2[%c32, %c0_18] : memref<1248x256xbf16, #tpu.memory_space<vmem>>, vector<8x256xbf16>
    %cst_19 = arith.constant dense<0.000000e+00> : vector<64x256xf32>
    %23 = tpu.matmul %21, %22, %cst_19 {dimension_numbers = #tpu.dot_dimension_numbers<[1], [0], [0], [1], [0, 0, 1, 1], [], []>} : vector<64x8xbf16>, vector<8x256xbf16>, vector<64x256xf32> -> vector<64x256xf32>
    %24 = arith.addf %19, %23 : vector<64x256xf32>
    %c2 = arith.constant 2 : index
    %c0_20 = arith.constant 0 : index
    %25 = vector.load %arg3[%c2, %c0_20] : memref<304x256xf32, #tpu.memory_space<vmem>>, vector<1x256xf32>
    %26 = vector.broadcast %25 : vector<1x256xf32> to vector<64x256xf32>
    %27 = arith.addf %24, %26 : vector<64x256xf32>
    %cst_21 = arith.constant dense<0.000000e+00> : vector<256xf32>
    %28 = vector.multi_reduction <add>, %27, %cst_21 [0] : vector<64x256xf32> to vector<256xf32>
    %29 = vector.shape_cast %28 : vector<256xf32> to vector<1x256xf32>
    %30 = arith.mulf %27, %27 : vector<64x256xf32>
    %cst_22 = arith.constant dense<0.000000e+00> : vector<256xf32>
    %31 = vector.multi_reduction <add>, %30, %cst_22 [0] : vector<64x256xf32> to vector<256xf32>
    %32 = vector.shape_cast %31 : vector<256xf32> to vector<1x256xf32>
    %33 = tpu.concatenate %29, %32 in 0 : vector<1x256xf32>, vector<1x256xf32> -> vector<2x256xf32>
    %cst_23 = arith.constant dense<0.000000e+00> : vector<2x32xf32>
    %34 = tpu.matmul %33, %16, %cst_23 {dimension_numbers = #tpu.dot_dimension_numbers<[1], [0], [0], [1], [0, 0, 1, 1], [], []>} : vector<2x256xf32>, vector<256x32xf32>, vector<2x32xf32> -> vector<2x32xf32>
    %cst_24 = arith.constant 0.001953125 : f32
    %35 = vector.broadcast %cst_24 : f32 to vector<2x32xf32>
    %36 = arith.mulf %34, %35 : vector<2x32xf32>
    %37 = vector.extract_strided_slice %36 {offsets = [0, 0], sizes = [1, 32], strides = [1, 1]} : vector<2x32xf32> to vector<1x32xf32>
    %38 = vector.extract_strided_slice %36 {offsets = [1, 0], sizes = [1, 32], strides = [1, 1]} : vector<2x32xf32> to vector<1x32xf32>
    %39 = arith.mulf %37, %37 : vector<1x32xf32>
    %40 = arith.subf %38, %39 : vector<1x32xf32>
    %cst_25 = arith.constant 0.000000e+00 : f32
    %41 = vector.broadcast %cst_25 : f32 to vector<1x32xf32>
    %42 = arith.maximumf %40, %41 : vector<1x32xf32>
    %c7 = arith.constant 7 : index
    %c0_26 = arith.constant 0 : index
    %43 = vector.load %arg3[%c7, %c0_26] : memref<304x256xf32, #tpu.memory_space<vmem>>, vector<1x32xf32>
    %cst_27 = arith.constant 9.99999974E-6 : f32
    %44 = vector.broadcast %cst_27 : f32 to vector<1x32xf32>
    %45 = arith.addf %42, %44 : vector<1x32xf32>
    %46 = math.rsqrt %45 : vector<1x32xf32>
    %47 = arith.mulf %43, %46 : vector<1x32xf32>
    %c8 = arith.constant 8 : index
    %c0_28 = arith.constant 0 : index
    %48 = vector.load %arg3[%c8, %c0_28] : memref<304x256xf32, #tpu.memory_space<vmem>>, vector<1x32xf32>
    %49 = arith.mulf %37, %47 : vector<1x32xf32>
    %50 = arith.subf %48, %49 : vector<1x32xf32>
    %51 = tpu.concatenate %47, %50 in 0 : vector<1x32xf32>, vector<1x32xf32> -> vector<2x32xf32>
    %cst_29 = arith.constant dense<0.000000e+00> : vector<2x256xf32>
    %52 = tpu.matmul %51, %15, %cst_29 {dimension_numbers = #tpu.dot_dimension_numbers<[1], [0], [0], [1], [0, 0, 1, 1], [], []>} : vector<2x32xf32>, vector<32x256xf32>, vector<2x256xf32> -> vector<2x256xf32>
    %53 = vector.extract_strided_slice %52 {offsets = [0, 0], sizes = [1, 256], strides = [1, 1]} : vector<2x256xf32> to vector<1x256xf32>
    %54 = vector.broadcast %53 : vector<1x256xf32> to vector<64x256xf32>
    %55 = arith.mulf %27, %54 : vector<64x256xf32>
    %56 = vector.extract_strided_slice %52 {offsets = [1, 0], sizes = [1, 256], strides = [1, 1]} : vector<2x256xf32> to vector<1x256xf32>
    %57 = vector.broadcast %56 : vector<1x256xf32> to vector<64x256xf32>
    %58 = arith.addf %55, %57 : vector<64x256xf32>
    %cst_30 = arith.constant 0.000000e+00 : f32
    %59 = vector.broadcast %cst_30 : f32 to vector<64x256xf32>
    %60 = arith.maximumf %58, %59 : vector<64x256xf32>
    %61 = arith.truncf %60 : vector<64x256xf32> to vector<64x256xbf16>
    %cst_31 = arith.constant dense<0.000000e+00> : vector<64x256xf32>
    %62 = tpu.matmul %0, %61, %cst_31 {dimension_numbers = #tpu.dot_dimension_numbers<[1], [0], [0], [1], [0, 0, 1, 1], [], []>} : vector<64x64xbf16>, vector<64x256xbf16>, vector<64x256xf32> -> vector<64x256xf32>
    %63 = arith.truncf %62 : vector<64x256xf32> to vector<64x256xbf16>
    %64 = tpu.concatenate %63, %61 in 1 : vector<64x256xbf16>, vector<64x256xbf16> -> vector<64x512xbf16>
    %c64 = arith.constant 64 : index
    %c0_32 = arith.constant 0 : index
    %65 = vector.load %arg2[%c64, %c0_32] : memref<1248x256xbf16, #tpu.memory_space<vmem>>, vector<512x256xbf16>
    %cst_33 = arith.constant dense<0.000000e+00> : vector<64x256xf32>
    %66 = tpu.matmul %64, %65, %cst_33 {dimension_numbers = #tpu.dot_dimension_numbers<[1], [0], [0], [1], [0, 0, 1, 1], [], []>} : vector<64x512xbf16>, vector<512x256xbf16>, vector<64x256xf32> -> vector<64x256xf32>
    %c3 = arith.constant 3 : index
    %c0_34 = arith.constant 0 : index
    %67 = vector.load %arg3[%c3, %c0_34] : memref<304x256xf32, #tpu.memory_space<vmem>>, vector<1x256xf32>
    %68 = vector.broadcast %67 : vector<1x256xf32> to vector<64x256xf32>
    %69 = arith.addf %66, %68 : vector<64x256xf32>
    %cst_35 = arith.constant dense<0.000000e+00> : vector<256xf32>
    %70 = vector.multi_reduction <add>, %69, %cst_35 [0] : vector<64x256xf32> to vector<256xf32>
    %71 = vector.shape_cast %70 : vector<256xf32> to vector<1x256xf32>
    %72 = arith.mulf %69, %69 : vector<64x256xf32>
    %cst_36 = arith.constant dense<0.000000e+00> : vector<256xf32>
    %73 = vector.multi_reduction <add>, %72, %cst_36 [0] : vector<64x256xf32> to vector<256xf32>
    %74 = vector.shape_cast %73 : vector<256xf32> to vector<1x256xf32>
    %75 = tpu.concatenate %71, %74 in 0 : vector<1x256xf32>, vector<1x256xf32> -> vector<2x256xf32>
    %cst_37 = arith.constant dense<0.000000e+00> : vector<2x32xf32>
    %76 = tpu.matmul %75, %16, %cst_37 {dimension_numbers = #tpu.dot_dimension_numbers<[1], [0], [0], [1], [0, 0, 1, 1], [], []>} : vector<2x256xf32>, vector<256x32xf32>, vector<2x32xf32> -> vector<2x32xf32>
    %cst_38 = arith.constant 0.001953125 : f32
    %77 = vector.broadcast %cst_38 : f32 to vector<2x32xf32>
    %78 = arith.mulf %76, %77 : vector<2x32xf32>
    %79 = vector.extract_strided_slice %78 {offsets = [0, 0], sizes = [1, 32], strides = [1, 1]} : vector<2x32xf32> to vector<1x32xf32>
    %80 = vector.extract_strided_slice %78 {offsets = [1, 0], sizes = [1, 32], strides = [1, 1]} : vector<2x32xf32> to vector<1x32xf32>
    %81 = arith.mulf %79, %79 : vector<1x32xf32>
    %82 = arith.subf %80, %81 : vector<1x32xf32>
    %cst_39 = arith.constant 0.000000e+00 : f32
    %83 = vector.broadcast %cst_39 : f32 to vector<1x32xf32>
    %84 = arith.maximumf %82, %83 : vector<1x32xf32>
    %c9 = arith.constant 9 : index
    %c0_40 = arith.constant 0 : index
    %85 = vector.load %arg3[%c9, %c0_40] : memref<304x256xf32, #tpu.memory_space<vmem>>, vector<1x32xf32>
    %cst_41 = arith.constant 9.99999974E-6 : f32
    %86 = vector.broadcast %cst_41 : f32 to vector<1x32xf32>
    %87 = arith.addf %84, %86 : vector<1x32xf32>
    %88 = math.rsqrt %87 : vector<1x32xf32>
    %89 = arith.mulf %85, %88 : vector<1x32xf32>
    %c10 = arith.constant 10 : index
    %c0_42 = arith.constant 0 : index
    %90 = vector.load %arg3[%c10, %c0_42] : memref<304x256xf32, #tpu.memory_space<vmem>>, vector<1x32xf32>
    %91 = arith.mulf %79, %89 : vector<1x32xf32>
    %92 = arith.subf %90, %91 : vector<1x32xf32>
    %93 = tpu.concatenate %89, %92 in 0 : vector<1x32xf32>, vector<1x32xf32> -> vector<2x32xf32>
    %cst_43 = arith.constant dense<0.000000e+00> : vector<2x256xf32>
    %94 = tpu.matmul %93, %15, %cst_43 {dimension_numbers = #tpu.dot_dimension_numbers<[1], [0], [0], [1], [0, 0, 1, 1], [], []>} : vector<2x32xf32>, vector<32x256xf32>, vector<2x256xf32> -> vector<2x256xf32>
    %95 = vector.extract_strided_slice %94 {offsets = [0, 0], sizes = [1, 256], strides = [1, 1]} : vector<2x256xf32> to vector<1x256xf32>
    %96 = vector.broadcast %95 : vector<1x256xf32> to vector<64x256xf32>
    %97 = arith.mulf %69, %96 : vector<64x256xf32>
    %98 = vector.extract_strided_slice %94 {offsets = [1, 0], sizes = [1, 256], strides = [1, 1]} : vector<2x256xf32> to vector<1x256xf32>
    %99 = vector.broadcast %98 : vector<1x256xf32> to vector<64x256xf32>
    %100 = arith.addf %97, %99 : vector<64x256xf32>
    %cst_44 = arith.constant 0.000000e+00 : f32
    %101 = vector.broadcast %cst_44 : f32 to vector<64x256xf32>
    %102 = arith.maximumf %100, %101 : vector<64x256xf32>
    %103 = arith.truncf %102 : vector<64x256xf32> to vector<64x256xbf16>
    %cst_45 = arith.constant dense<0.000000e+00> : vector<64x256xf32>
    %104 = tpu.matmul %0, %103, %cst_45 {dimension_numbers = #tpu.dot_dimension_numbers<[1], [0], [0], [1], [0, 0, 1, 1], [], []>} : vector<64x64xbf16>, vector<64x256xbf16>, vector<64x256xf32> -> vector<64x256xf32>
    %105 = arith.truncf %104 : vector<64x256xf32> to vector<64x256xbf16>
    %106 = tpu.concatenate %105, %103 in 1 : vector<64x256xbf16>, vector<64x256xbf16> -> vector<64x512xbf16>
    %c576 = arith.constant 576 : index
    %c0_46 = arith.constant 0 : index
    %107 = vector.load %arg2[%c576, %c0_46] : memref<1248x256xbf16, #tpu.memory_space<vmem>>, vector<512x32xbf16>
    %cst_47 = arith.constant dense<0.000000e+00> : vector<64x32xf32>
    %108 = tpu.matmul %106, %107, %cst_47 {dimension_numbers = #tpu.dot_dimension_numbers<[1], [0], [0], [1], [0, 0, 1, 1], [], []>} : vector<64x512xbf16>, vector<512x32xbf16>, vector<64x32xf32> -> vector<64x32xf32>
    %c4 = arith.constant 4 : index
    %c0_48 = arith.constant 0 : index
    %109 = vector.load %arg3[%c4, %c0_48] : memref<304x256xf32, #tpu.memory_space<vmem>>, vector<1x32xf32>
    %110 = vector.broadcast %109 : vector<1x32xf32> to vector<64x32xf32>
    %111 = arith.addf %108, %110 : vector<64x32xf32>
    %112 = arith.truncf %111 : vector<64x32xf32> to vector<64x32xbf16>
    %c1088 = arith.constant 1088 : index
    %c0_49 = arith.constant 0 : index
    %113 = vector.load %arg2[%c1088, %c0_49] : memref<1248x256xbf16, #tpu.memory_space<vmem>>, vector<32x128xbf16>
    %cst_50 = arith.constant dense<0.000000e+00> : vector<64x128xf32>
    %114 = tpu.matmul %112, %113, %cst_50 {dimension_numbers = #tpu.dot_dimension_numbers<[1], [0], [0], [1], [0, 0, 1, 1], [], []>} : vector<64x32xbf16>, vector<32x128xbf16>, vector<64x128xf32> -> vector<64x128xf32>
    %c5 = arith.constant 5 : index
    %c0_51 = arith.constant 0 : index
    %115 = vector.load %arg3[%c5, %c0_51] : memref<304x256xf32, #tpu.memory_space<vmem>>, vector<1x128xf32>
    %116 = vector.broadcast %115 : vector<1x128xf32> to vector<64x128xf32>
    %117 = arith.addf %114, %116 : vector<64x128xf32>
    %cst_52 = arith.constant 0.000000e+00 : f32
    %118 = vector.broadcast %cst_52 : f32 to vector<64x128xf32>
    %119 = arith.maximumf %117, %118 : vector<64x128xf32>
    %120 = arith.truncf %119 : vector<64x128xf32> to vector<64x128xbf16>
    %c1120 = arith.constant 1120 : index
    %c0_53 = arith.constant 0 : index
    %121 = vector.load %arg2[%c1120, %c0_53] : memref<1248x256xbf16, #tpu.memory_space<vmem>>, vector<128x128xbf16>
    %cst_54 = arith.constant dense<0.000000e+00> : vector<64x128xf32>
    %122 = tpu.matmul %120, %121, %cst_54 {dimension_numbers = #tpu.dot_dimension_numbers<[1], [0], [0], [1], [0, 0, 1, 1], [], []>} : vector<64x128xbf16>, vector<128x128xbf16>, vector<64x128xf32> -> vector<64x128xf32>
    %c6 = arith.constant 6 : index
    %c0_55 = arith.constant 0 : index
    %123 = vector.load %arg3[%c6, %c0_55] : memref<304x256xf32, #tpu.memory_space<vmem>>, vector<1x128xf32>
    %124 = vector.broadcast %123 : vector<1x128xf32> to vector<64x128xf32>
    %125 = arith.addf %122, %124 : vector<64x128xf32>
    %c0_56 = arith.constant 0 : index
    %c0_57 = arith.constant 0 : index
    %126 = vector.load %arg4[%c0_56, %c0_57] : memref<64x128xf32, #tpu.memory_space<vmem>>, vector<64x128xf32>
    tpu.vector_store %arg4[%c0_56, %c0_57], %125 {strides = array<i32>} : memref<64x128xf32, #tpu.memory_space<vmem>>, vector<64x128xf32>,
    return
  }
}

</mosaic_0001>

<bundles_post_ra>
// kernel: forward.1
= control target key start
LH: loop header
LB: loop body
LE: loop exit
PB: predicated region body
PF: predicated region fallthrough
CT: control target
= control target key end

     0   :  { %9 = vsyncpa [#allocation3], 0  ;;  %s3698_s0 = inlined_call_operand.vmem [shape: bf16[64,4], index: 0, kind: input, shape index: {}]   ;;  %s3699_s1 = inlined_call_operand.vmem [shape: bf16[64,64], index: 1, kind: input, shape index: {}]   ;;  %s3700_s2 = inlined_call_operand.hbm [shape: bf16[1248,256], index: 2, kind: input, shape index: {}]   ;;  %s3701_s3 = inlined_call_operand.hbm [shape: f32[304,256], index: 3, kind: input, shape index: {}]   ;;  %s3702_s4 = inlined_call_operand.vmem [shape: f32[64,128], index: 4, kind: output, shape index: {}]  }
   0x1   :  { %s19_s17 = sshll.u32 %s3700_s2, 4  ;;  %s20_s17 = int_to_ptr.hbm [resolvable:$true] %s19_s17 }
   0x2   :  { %10 = vsyncpa [#allocation5], 0  ;;  %s3183_s18 = smov [#allocation2]   ;;  %s32_s22 = sshll.u32 %s3701_s3, 4  ;;  %s33_s22 = int_to_ptr.hbm [resolvable:$true] %s32_s22 }
   0x3   :  { %s21_s19 = sshll.u32 %s3183_s18, 4  ;;  %s3184_s23 = smov 128   ;;  %s22_s19 = int_to_ptr.vmem [resolvable:$true] %s21_s19 }
   0x4   :  { %s3185_s24 = smov 8   ;;  %s3186_s25 = smov [#allocation4]  }
   0x5   :  { %27 = dma.hbm_to_vmem [thread:$0]  %s20_s17, 19968, %s22_s19, [#allocation3], %s3184_s23, %s3184_s23, %s3185_s24  }
   0x6   :  { %s34_s26 = sshll.u32 %s3186_s25, 4  ;;  %s3187_s27 = smov 256   ;;  %s35_s26 = int_to_ptr.vmem [resolvable:$true] %s34_s26 }
   0x7   :  { %s3188_s28 = smov 16  }
   0x8   :  { %40 = dma.hbm_to_vmem [thread:$0]  %s33_s22, 9728, %s35_s26, [#allocation5], %s3187_s27, %s3187_s27, %s3188_s28  }
   0x9   :  { %3179 = dma.done.wait [#allocation3], 19968  }
   0xa   :  { %3180 = vsyncadd [#allocation3], 4294947328 }
   0xb   :  { %3181 = dma.done.wait [#allocation5], 9728  }
   0xc   :  { %3182 = vsyncadd [#allocation5], 4294957568  ;;  %vm101_vm0 = vcmask 1041408   ;;  %v66_v0 = vld [vmem:[#allocation2] sm:$0x3]  ;;  %vm88_vm1 = vcmask 31744  }
   0xd   :  { %v103_v1 = vsel %vm101_vm0, %v66_v0, 0  ;;  %v2970_v2 = vld [vmem:[%s3698_s0] sm:$0xff]  ;;  %v2971_v3 = vld [vmem:[%s3698_s0 + $0x8] sm:$0xff]  ;;  %v2972_v4 = vld [vmem:[%s3698_s0 + $0x10] sm:$0xff]  ;;  %vm155_vm2 = vcmask 130048   ;;  %vm327_vm3 = vcmask 1043456  }
   0xe   :  { %112 = vmatpush.bf16.msra.mxu0 %v103_v1  ;;  %v2973_v5 = vld [vmem:[%s3698_s0 + $0x18] sm:$0xff]  ;;  %v2476_v6 = vld [vmem:[#allocation2 + $0x10] sm:$0xf]  ;;  %v67_v10 = vld [vmem:[#allocation4] ss:$0 sm:$0xff]  ;;  %vm314_vm4 = vcmask 64512  }
   0xf   :  { %v2974_v7 = vld [vmem:[#allocation2 + $0x14] sm:$0xf0]  ;;  %v3236_v38 = vld [vmem:[#allocation2 + $0x30] sm:$0xff]  ;;  %v148_v43 = vld [vmem:[#allocation4 + $0x1] ss:$0 sm:$0xff]  ;;  %vm262_vm5 = vcmask 523264  }
  0x10   :  { %v2477_v8 = vor.u32 %v2974_v7, %v2476_v6  ;;  %v393_v39 = vunpack.c.l.b16 %v3236_v38  ;;  %v3250_v63 = vld [vmem:[%s3699_s1] sm:$0xff]  ;;  %v3258_v0 = vld [vmem:[%s3699_s1 + $0x8] sm:$0xff]  ;;  %v3265_v1 = vld [vmem:[%s3699_s1 + $0x10] sm:$0xff]  ;;  %vm564_vm6 = vcmask 1040384   ;;  %vm637_vm10 = vcmask 261120  }
  0x11   :  { %2470 = vmatmul.msk.bf16.vlgmr.msra.gmra.mxu0 %vm88_vm1, %v2970_v2  ;;  %v3272_v2 = vld [vmem:[%s3699_s1 + $0x18] sm:$0xff] }
  0x12   :  { %175 = vmatpush.bf16.msra.mxu1 %v2477_v8  ;;  %v395_v40 = vpack.c.b16 %v393_v39, %v393_v39 }
  0x14   :  { %v410_v41 = vsel %vm327_vm3, %v395_v40, 0  ;;  %v214_v40 = vld [vmem:[#allocation4 + $0xf0] sm:$0xff] }
  0x16   :  { %422 = vmatpush.bf16.msrb.mxu1 %v410_v41  ;;  %v213_v41 = vld [vmem:[#allocation4 + $0xe0] sm:$0xff] }
  0x21   :  { %2471 = vmatmul.msk.bf16.gmra.mxu0 %vm88_vm1, %v2971_v3  ;;  %v308_v3 = vld [vmem:[#allocation2 + $0x20] sm:$0xff] }
  0x31   :  { %2472 = vmatmul.msk.bf16.gmra.mxu0 %vm88_vm1, %v2972_v4  ;;  %v310_v4 = vunpack.c.l.b16 %v308_v3 }
  0x33   :  { %v312_v6 = vpack.c.b16 %v310_v4, %v310_v4 }
  0x35   :  { %v329_v8 = vsel %vm327_vm3, %v312_v6, 0 }
  0x36   :  { %341 = vmatpush.bf16.msra.mxu3 %v329_v8 }
  0x41   :  { %2473 = vmatmul.msk.bf16.gmra.mxu0 %vm88_vm1, %v2973_v5  ;;  %v311_v5 = vunpack.c.h.b16 %v308_v3 }
  0x43   :  { %v313_v7 = vpack.c.b16 %v311_v5, %v311_v5 }
  0x8e   :  { %v114_v9 = vpop.f32.mrf.mxu0 }
  0x8f   :  { %v115_v11 = vadd.f32 %v114_v9, %v67_v10  ;;  %v332_v9 = vsel %vm327_vm3, %v313_v7, 0 }
  0x90   :  { %370 = vmatpush.bf16.msrb.mxu0 %v332_v9 }
  0x91   :  { %v134_v14 = vmax.f32 %v115_v11, 0.0 }
  0x96   :  { %v116_v12 = vpop.f32.mrf.mxu0 }
  0x97   :  { %v117_v13 = vadd.f32 %v116_v12, %v67_v10 }
  0x99   :  { %v135_v15 = vmax.f32 %v117_v13, 0.0 }
  0x9b   :  { %v142_v16 = vpack.c.bf16 %v135_v15, %v134_v14 }
  0x9d   :  { %2478 = vmatmul.msk.bf16.vlgmr.msra.gmra.mxu1 %vm155_vm2, %v142_v16  ;;  %v394_v16 = vunpack.c.h.b16 %v3236_v38  ;;  %v215_v38 = vld [vmem:[#allocation4 + $0x100] sm:$0xff] }
  0x9e   :  { %v119_v17 = vpop.f32.mrf.mxu0 }
  0x9f   :  { %v120_v18 = vadd.f32 %v119_v17, %v67_v10  ;;  %v396_v17 = vpack.c.b16 %v394_v16, %v394_v16 }
  0xa1   :  { %v136_v21 = vmax.f32 %v120_v18, 0.0  ;;  %v413_v18 = vsel %vm327_vm3, %v396_v17, 0 }
  0xa2   :  { %451 = vmatpush.bf16.msrb.mxu3 %v413_v18 }
  0xa6   :  { %v121_v19 = vpop.f32.mrf.mxu0 }
  0xa7   :  { %v122_v20 = vadd.f32 %v121_v19, %v67_v10 }
  0xa9   :  { %v137_v22 = vmax.f32 %v122_v20, 0.0 }
  0xab   :  { %v143_v23 = vpack.c.bf16 %v137_v22, %v136_v21 }
  0xad   :  { %2479 = vmatmul.msk.bf16.gmra.mxu1 %vm155_vm2, %v143_v23 }
  0xae   :  { %v124_v24 = vpop.f32.mrf.mxu0 }
  0xaf   :  { %v125_v25 = vadd.f32 %v124_v24, %v67_v10 }
  0xb1   :  { %v138_v28 = vmax.f32 %v125_v25, 0.0 }
  0xb6   :  { %v126_v26 = vpop.f32.mrf.mxu0 }
  0xb7   :  { %v127_v27 = vadd.f32 %v126_v26, %v67_v10 }
  0xb9   :  { %v139_v29 = vmax.f32 %v127_v27, 0.0 }
  0xbb   :  { %v144_v30 = vpack.c.bf16 %v139_v29, %v138_v28 }
  0xbd   :  { %2480 = vmatmul.msk.bf16.gmra.mxu1 %vm155_vm2, %v144_v30  ;;  %v220_v30 = vld [vmem:[#allocation4 + $0x150] sm:$0xff] }
  0xbe   :  { %v129_v31 = vpop.f32.mrf.mxu0 }
  0xbf   :  { %v130_v32 = vadd.f32 %v129_v31, %v67_v10 }
  0xc1   :  { %v140_v35 = vmax.f32 %v130_v32, 0.0 }
  0xc6   :  { %v131_v33 = vpop.f32.mrf.mxu0 }
  0xc7   :  { %v132_v34 = vadd.f32 %v131_v33, %v67_v10  ;;  %v219_v33 = vld [vmem:[#allocation4 + $0x140] sm:$0xff] }
  0xc9   :  { %v141_v36 = vmax.f32 %v132_v34, 0.0  ;;  %v218_v34 = vld [vmem:[#allocation4 + $0x130] sm:$0xff] }
  0xcb   :  { %v145_v37 = vpack.c.bf16 %v141_v36, %v140_v35  ;;  %v217_v35 = vld [vmem:[#allocation4 + $0x120] sm:$0xff]  ;;  %v216_v36 = vld [vmem:[#allocation4 + $0x110] sm:$0xff] }
  0xcd   :  { %2481 = vmatmul.msk.bf16.gmra.mxu1 %vm155_vm2, %v145_v37 }
 0x11a   :  { %v177_v42 = vpop.f32.mrf.mxu1 }
 0x11b   :  { %v178_v45 = vadd.f32 %v177_v42, %v148_v43  ;;  %v212_v42 = vld [vmem:[#allocation4 + $0xd0] sm:$0xff] }
 0x122   :  { %v179_v44 = vpop.f32.mrf.mxu1 }
 0x123   :  { %v180_v46 = vadd.f32 %v179_v44, %v148_v43  ;;  %v211_v44 = vld [vmem:[#allocation4 + $0xc0] sm:$0xff] }
 0x125   :  { %v3240_v47 = vpack.c.bf16 %v180_v46, %v178_v45  ;;  %v210_v45 = vld [vmem:[#allocation4 + $0xb0] sm:$0xff] }
 0x127   :  { %2510 = vmatmul.msk.bf16.vlgmr.msrb.gmra.mxu1 %vm314_vm4, %v3240_v47 }
 0x12a   :  { %v182_v48 = vpop.f32.mrf.mxu1 }
 0x12b   :  { %v183_v50 = vadd.f32 %v182_v48, %v148_v43  ;;  %v3293_v48 = vld [vmem:[#allocation4 + $0x2] ss:$8 sm:$0x3] }
 0x132   :  { %v184_v49 = vpop.f32.mrf.mxu1 }
 0x133   :  { %v185_v51 = vadd.f32 %v184_v49, %v148_v43  ;;  %v208_v49 = vld [vmem:[#allocation4 + $0x90] sm:$0xff] }
 0x135   :  { %v238_v52 = vpack.c.bf16 %v185_v51, %v183_v50 }
 0x137   :  { %2511 = vmatmul.msk.bf16.gmra.mxu1 %vm314_vm4, %v238_v52 }
 0x13a   :  { %v187_v53 = vpop.f32.mrf.mxu1 }
 0x13b   :  { %v188_v55 = vadd.f32 %v187_v53, %v148_v43 }
 0x142   :  { %v189_v54 = vpop.f32.mrf.mxu1 }
 0x143   :  { %v190_v56 = vadd.f32 %v189_v54, %v148_v43  ;;  %v207_v54 = vld [vmem:[#allocation4 + $0x80] sm:$0xff] }
 0x145   :  { %v239_v57 = vpack.c.bf16 %v190_v56, %v188_v55  ;;  %v206_v56 = vld [vmem:[#allocation4 + $0x70] sm:$0xff] }
 0x147   :  { %2512 = vmatmul.msk.bf16.gmra.mxu1 %vm314_vm4, %v239_v57 }
 0x14a   :  { %v192_v58 = vpop.f32.mrf.mxu1 }
 0x14b   :  { %v193_v60 = vadd.f32 %v192_v58, %v148_v43 }
 0x152   :  { %v194_v59 = vpop.f32.mrf.mxu1 }
 0x153   :  { %v195_v61 = vadd.f32 %v194_v59, %v148_v43 }
 0x155   :  { %v240_v62 = vpack.c.bf16 %v195_v61, %v193_v60  ;;  %v205_v60 = vld [vmem:[#allocation4 + $0x60] sm:$0xff] }
 0x157   :  { %279 = vmatpush.bf16.msra.mxu2 %v240_v62  ;;  %2513 = vmatmul.msk.bf16.gmra.mxu1 %vm314_vm4, %v240_v62 }
 0x15b   :  { %280 = vmatpush.bf16.msra.mxu2 %v239_v57 }
 0x15f   :  { %281 = vmatpush.bf16.msra.mxu2 %v238_v52 }
 0x163   :  { %282 = vmatpush.bf16.msra.mxu2 %v3240_v47 }
 0x166   :  { %2498 = vmatmul.msk.bf16.vlgmr.msra.gmra.mxu2 %vm262_vm5, %v3250_v63 }
 0x167   :  { %567 = vmatpush.msrb.mxu2 %v220_v30 }
 0x169   :  { %568 = vmatpush.msrb.mxu2 %v219_v33 }
 0x16b   :  { %569 = vmatpush.msrb.mxu2 %v218_v34 }
 0x16d   :  { %570 = vmatpush.msrb.mxu2 %v217_v35 }
 0x16f   :  { %571 = vmatpush.msrb.mxu2 %v216_v36 }
 0x171   :  { %572 = vmatpush.msrb.mxu2 %v215_v38 }
 0x173   :  { %573 = vmatpush.msrb.mxu2 %v214_v40 }
 0x175   :  { %574 = vmatpush.msrb.mxu2 %v213_v41 }
 0x176   :  { %2499 = vmatmul.msk.bf16.gmra.mxu2 %vm262_vm5, %v3258_v0 }
 0x177   :  { %575 = vmatpush.msrb.mxu2 %v212_v42 }
 0x179   :  { %576 = vmatpush.msrb.mxu2 %v211_v44 }
 0x17b   :  { %577 = vmatpush.msrb.mxu2 %v210_v45 }
 0x186   :  { %2500 = vmatmul.msk.bf16.gmra.mxu2 %vm262_vm5, %v3265_v1 }
 0x196   :  { %2501 = vmatmul.msk.bf16.gmra.mxu2 %vm262_vm5, %v3272_v2 }
 0x1a4   :  { %v424_v25 = vpop.f32.mrf.mxu1 }
 0x1ac   :  { %v426_v26 = vpop.f32.mrf.mxu1 }
 0x1b4   :  { %v429_v28 = vpop.f32.mrf.mxu1 }
 0x1bc   :  { %v431_v31 = vpop.f32.mrf.mxu1 }
 0x1c4   :  { %v434_v39 = vpop.f32.mrf.mxu1 }
 0x1cc   :  { %v436_v46 = vpop.f32.mrf.mxu1 }
 0x1d4   :  { %v439_v3 = vpop.f32.mrf.mxu1 }
 0x1e9   :  { %v284_v10 = vpop.f32.mrf.mxu2 }
 0x1f1   :  { %v286_v11 = vpop.f32.mrf.mxu2 }
 0x1f2   :  { %v304_v12 = vpack.c.bf16 %v286_v11, %v284_v10 }
 0x1f4   :  { %2502 = vmatmul.msk.bf16.vlgmr.msra.gmra.mxu3 %vm314_vm4, %v304_v12  ;;  %2506 = vmatmul.msk.bf16.vlgmr.msrb.gmra.mxu0 %vm314_vm4, %v304_v12 }
 0x1f9   :  { %v289_v13 = vpop.f32.mrf.mxu2 }
 0x201   :  { %v291_v14 = vpop.f32.mrf.mxu2 }
 0x202   :  { %v305_v15 = vpack.c.bf16 %v291_v14, %v289_v13 }
 0x204   :  { %2503 = vmatmul.msk.bf16.gmra.mxu3 %vm314_vm4, %v305_v15  ;;  %2507 = vmatmul.msk.bf16.gmra.mxu0 %vm314_vm4, %v305_v15 }
 0x209   :  { %v294_v19 = vpop.f32.mrf.mxu2 }
 0x211   :  { %v296_v20 = vpop.f32.mrf.mxu2 }
 0x212   :  { %v306_v21 = vpack.c.bf16 %v296_v20, %v294_v19 }
 0x214   :  { %2504 = vmatmul.msk.bf16.gmra.mxu3 %vm314_vm4, %v306_v21  ;;  %2508 = vmatmul.msk.bf16.gmra.mxu0 %vm314_vm4, %v306_v21 }
 0x219   :  { %v299_v22 = vpop.f32.mrf.mxu2 }
 0x221   :  { %v301_v23 = vpop.f32.mrf.mxu2 }
 0x222   :  { %v307_v24 = vpack.c.bf16 %v301_v23, %v299_v22 }
 0x224   :  { %2505 = vmatmul.msk.bf16.gmra.mxu3 %vm314_vm4, %v307_v24  ;;  %2509 = vmatmul.msk.bf16.gmra.mxu0 %vm314_vm4, %v307_v24 }
 0x234   :  { %2514 = vmatmul.msk.bf16.vlgmr.msrb.gmra.mxu3 %vm314_vm4, %v3240_v47  ;;  %v209_v47 = vld [vmem:[#allocation4 + $0xa0] sm:$0xff] }
 0x235   :  { %578 = vmatpush.msrb.mxu2 %v209_v47 }
 0x237   :  { %579 = vmatpush.msrb.mxu2 %v208_v49 }
 0x239   :  { %580 = vmatpush.msrb.mxu2 %v207_v54 }
 0x23b   :  { %581 = vmatpush.msrb.mxu2 %v206_v56  ;;  %v236_v56 = vld [vmem:[#allocation4 + $0x250] sm:$0xff] }
 0x23d   :  { %582 = vmatpush.msrb.mxu2 %v205_v60 }
 0x23f   :  { %587 = vmatpush.msra.mxu2 %v236_v56 }
 0x244   :  { %2515 = vmatmul.msk.bf16.gmra.mxu3 %vm314_vm4, %v238_v52  ;;  %v476_v52 = vperm.slane %v3293_v48, 0 }
 0x254   :  { %2516 = vmatmul.msk.bf16.gmra.mxu3 %vm314_vm4, %v239_v57 }
 0x264   :  { %2517 = vmatmul.msk.bf16.gmra.mxu3 %vm314_vm4, %v240_v62 }
 0x271   :  { %v3314_v13 = vpop.f32.mrf.mxu0 }
 0x277   :  { %v343_v27 = vpop.f32.mrf.mxu3 }
 0x278   :  { %v425_v51 = vadd.f32 %v424_v25, %v343_v27  ;;  %v441_v25 = vpop.f32.mrf.mxu1 }
 0x279   :  { %v374_v34 = vpop.f32.mrf.mxu0 }
 0x27a   :  { %v3298_v59 = vadd.f32 %v476_v52, %v425_v51 }
 0x27c   :  { %v522_v7 = vmul.f32 %v3298_v59, %v3298_v59 }
 0x27f   :  { %v345_v29 = vpop.f32.mrf.mxu3 }
 0x280   :  { %v427_v50 = vadd.f32 %v426_v26, %v345_v29 }
 0x281   :  { %v377_v47 = vpop.f32.mrf.mxu0 }
 0x282   :  { %v3296_v57 = vadd.f32 %v476_v52, %v427_v50 }
 0x284   :  { %v524_v4 = vmul.f32 %v3296_v57, %v3296_v57  ;;  %v496_v9 = vadd.f32 %v3296_v57, %v3298_v59 }
 0x286   :  { %v538_v14 = vadd.f32 %v524_v4, %v522_v7  ;;  %v233_v4 = vld [vmem:[#allocation4 + $0x220] sm:$0xff] }
 0x287   :  { %v348_v32 = vpop.f32.mrf.mxu3 }
 0x288   :  { %v430_v55 = vadd.f32 %v429_v28, %v348_v32 }
 0x28a   :  { %v3300_v61 = vadd.f32 %v476_v52, %v430_v55 }
 0x28c   :  { %v526_v10 = vmul.f32 %v3300_v61, %v3300_v61  ;;  %v497_v15 = vadd.f32 %v496_v9, %v3300_v61 }
 0x28e   :  { %v539_v18 = vadd.f32 %v538_v14, %v526_v10  ;;  %v230_v10 = vld [vmem:[#allocation4 + $0x1f0] sm:$0xff] }
 0x28f   :  { %v350_v37 = vpop.f32.mrf.mxu3  ;;  %v228_v14 = vld [vmem:[#allocation4 + $0x1d0] sm:$0xff] }
 0x290   :  { %v432_v58 = vadd.f32 %v431_v31, %v350_v37 }
 0x292   :  { %v3304_v5 = vadd.f32 %v476_v52, %v432_v58  ;;  %v379_v58 = vpop.f32.mrf.mxu0 }
 0x294   :  { %v528_v16 = vmul.f32 %v3304_v5, %v3304_v5  ;;  %v498_v19 = vadd.f32 %v497_v15, %v3304_v5 }
 0x296   :  { %v540_v22 = vadd.f32 %v539_v18, %v528_v16  ;;  %v227_v16 = vld [vmem:[#allocation4 + $0x1c0] sm:$0xff]  ;;  %v226_v18 = vld [vmem:[#allocation4 + $0x1b0] sm:$0xff] }
 0x297   :  { %v353_v43 = vpop.f32.mrf.mxu3 }
 0x298   :  { %v435_v62 = vadd.f32 %v434_v39, %v353_v43 }
 0x29a   :  { %v3312_v11 = vadd.f32 %v476_v52, %v435_v62  ;;  %v235_v62 = vld [vmem:[#allocation4 + $0x240] sm:$0xff]  ;;  %v382_v9 = vpop.f32.mrf.mxu0 }
 0x29b   :  { %588 = vmatpush.msra.mxu2 %v235_v62 }
 0x29c   :  { %v530_v20 = vmul.f32 %v3312_v11, %v3312_v11  ;;  %v499_v23 = vadd.f32 %v498_v19, %v3312_v11  ;;  %v225_v19 = vld [vmem:[#allocation4 + $0x1a0] sm:$0xff] }
 0x29e   :  { %v541_v27 = vadd.f32 %v540_v22, %v530_v20  ;;  %v224_v22 = vld [vmem:[#allocation4 + $0x190] sm:$0xff] }
 0x29f   :  { %v355_v53 = vpop.f32.mrf.mxu3 }
 0x2a0   :  { %v437_v6 = vadd.f32 %v436_v46, %v355_v53 }
 0x2a2   :  { %v3319_v17 = vadd.f32 %v476_v52, %v437_v6  ;;  %v232_v6 = vld [vmem:[#allocation4 + $0x210] sm:$0xff]  ;;  %v384_v20 = vpop.f32.mrf.mxu0 }
 0x2a4   :  { %v532_v24 = vmul.f32 %v3319_v17, %v3319_v17  ;;  %v500_v28 = vadd.f32 %v499_v23, %v3319_v17  ;;  %v223_v23 = vld [vmem:[#allocation4 + $0x180] sm:$0xff] }
 0x2a6   :  { %v542_v31 = vadd.f32 %v541_v27, %v532_v24 }
 0x2a7   :  { %v358_v8 = vpop.f32.mrf.mxu3 }
 0x2a8   :  { %v440_v12 = vadd.f32 %v439_v3, %v358_v8  ;;  %v234_v3 = vld [vmem:[#allocation4 + $0x230] sm:$0xff]  ;;  %v231_v8 = vld [vmem:[#allocation4 + $0x200] sm:$0xff] }
 0x2a9   :  { %589 = vmatpush.msra.mxu2 %v234_v3 }
 0x2aa   :  { %v3324_v21 = vadd.f32 %v476_v52, %v440_v12  ;;  %v229_v12 = vld [vmem:[#allocation4 + $0x1e0] sm:$0xff] }
 0x2ab   :  { %590 = vmatpush.msra.mxu2 %v233_v4 }
 0x2ac   :  { %v534_v29 = vmul.f32 %v3324_v21, %v3324_v21  ;;  %v501_v32 = vadd.f32 %v500_v28, %v3324_v21  ;;  %v222_v28 = vld [vmem:[#allocation4 + $0x170] sm:$0xff] }
 0x2ad   :  { %591 = vmatpush.msra.mxu2 %v232_v6 }
 0x2ae   :  { %v543_v35 = vadd.f32 %v542_v31, %v534_v29 }
 0x2af   :  { %v360_v26 = vpop.f32.mrf.mxu3  ;;  %592 = vmatpush.msra.mxu2 %v231_v8 }
 0x2b0   :  { %v442_v30 = vadd.f32 %v441_v25, %v360_v26  ;;  %v477_v26 = vperm.slane %v3293_v48, 1 }
 0x2b1   :  { %593 = vmatpush.msra.mxu2 %v230_v10 }
 0x2b2   :  { %v3333_v33 = vadd.f32 %v476_v52, %v442_v30  ;;  %v221_v30 = vld [vmem:[#allocation4 + $0x160] sm:$0xff] }
 0x2b3   :  { %594 = vmatpush.msra.mxu2 %v229_v12 }
 0x2b4   :  { %v502_v36 = vadd.f32 %v501_v32, %v3333_v33  ;;  %v536_v37 = vmul.f32 %v3333_v33, %v3333_v33 }
 0x2b5   :  { %595 = vmatpush.msra.mxu2 %v228_v14 }
 0x2b6   :  { %v503_v38 = vrot.slane %v502_v36, 4  ;;  %v544_v39 = vadd.f32 %v543_v35, %v536_v37 }
 0x2b7   :  { %v453_v40 = vpop.f32.mrf.mxu3  ;;  %596 = vmatpush.msra.mxu2 %v227_v16 }
 0x2b8   :  { %v504_v41 = vadd.f32 %v503_v38, %v502_v36  ;;  %v545_v42 = vrot.slane %v544_v39, 4  ;;  %v454_v25 = vadd.f32 %v453_v40, %v3314_v13 }
 0x2b9   :  { %597 = vmatpush.msra.mxu2 %v226_v18 }
 0x2ba   :  { %v505_v43 = vrot.slane %v504_v41, 2  ;;  %v546_v44 = vadd.f32 %v545_v42, %v544_v39  ;;  %v3343_v35 = vadd.f32 %v477_v26, %v454_v25 }
 0x2bb   :  { %598 = vmatpush.msra.mxu2 %v225_v19 }
 0x2bc   :  { %v506_v45 = vadd.f32 %v505_v43, %v504_v41  ;;  %v547_v46 = vrot.slane %v546_v44, 2  ;;  %v523_v39 = vmul.f32 %v3343_v35, %v3343_v35 }
 0x2bd   :  { %599 = vmatpush.msra.mxu2 %v224_v22 }
 0x2be   :  { %v507_v49 = vrot.slane %v506_v45, 1  ;;  %v548_v50 = vadd.f32 %v547_v46, %v546_v44 }
 0x2bf   :  { %v455_v51 = vpop.f32.mrf.mxu3  ;;  %600 = vmatpush.msra.mxu2 %v223_v23 }
 0x2c0   :  { %v549_v52 = vrot.slane %v548_v50, 1  ;;  %v508_v53 = vadd.f32 %v507_v49, %v506_v45  ;;  %v456_v24 = vadd.f32 %v455_v51, %v374_v34  ;;  %v387_v34 = vpop.f32.mrf.mxu0 }
 0x2c1   :  { %601 = vmatpush.msra.mxu2 %v222_v28 }
 0x2c2   :  { %v550_v54 = vadd.f32 %v549_v52, %v548_v50  ;;  %v3341_v31 = vadd.f32 %v477_v26, %v456_v24 }
 0x2c3   :  { %602 = vmatpush.msra.mxu2 %v221_v30 }
 0x2c4   :  { %v565_v55 = vsel %vm564_vm6, %v508_v53, %v550_v54  ;;  %v525_v13 = vmul.f32 %v3341_v31, %v3341_v31  ;;  %v509_v41 = vadd.f32 %v3341_v31, %v3343_v35 }
 0x2c5   :  { %583 = vmatmul.f32.vlgmr.msrb.gmra.mxu2 %v565_v55 }
 0x2c6   :  { %v551_v45 = vadd.f32 %v525_v13, %v523_v39 }
 0x2c7   :  { %v458_v60 = vpop.f32.mrf.mxu3 }
 0x2c8   :  { %v459_v29 = vadd.f32 %v458_v60, %v377_v47 }
 0x2ca   :  { %v3345_v36 = vadd.f32 %v477_v26, %v459_v29 }
 0x2cc   :  { %v527_v42 = vmul.f32 %v3345_v36, %v3345_v36  ;;  %v510_v46 = vadd.f32 %v509_v41, %v3345_v36 }
 0x2ce   :  { %v552_v50 = vadd.f32 %v551_v45, %v527_v42  ;;  %v3388_v42 = vld [vmem:[#allocation4 + $0x30] sm:$0xff]  ;;  %v3391_v45 = vld [vmem:[#allocation4 + $0x20] sm:$0xff] }
 0x2cf   :  { %v460_v7 = vpop.f32.mrf.mxu3 }
 0x2d0   :  { %v461_v32 = vadd.f32 %v460_v7, %v379_v58  ;;  %v389_v58 = vpop.f32.mrf.mxu0 }
 0x2d2   :  { %v3349_v48 = vadd.f32 %v477_v26, %v461_v32 }
 0x2d4   :  { %v529_v47 = vmul.f32 %v3349_v48, %v3349_v48  ;;  %v511_v51 = vadd.f32 %v510_v46, %v3349_v48 }
 0x2d6   :  { %v553_v54 = vadd.f32 %v552_v50, %v529_v47  ;;  %v204_v47 = vld [vmem:[#allocation4 + $0x58] sm:$0xff]  ;;  %v202_v50 = vld [vmem:[#allocation4 + $0x48] sm:$0xff] }
 0x2d7   :  { %v463_v15 = vpop.f32.mrf.mxu3 }
 0x2d8   :  { %v464_v37 = vadd.f32 %v463_v15, %v382_v9 }
 0x2da   :  { %v3357_v43 = vadd.f32 %v477_v26, %v464_v37 }
 0x2dc   :  { %v531_v52 = vmul.f32 %v3357_v43, %v3357_v43  ;;  %v512_v55 = vadd.f32 %v511_v51, %v3357_v43 }
 0x2de   :  { %v554_v62 = vadd.f32 %v553_v54, %v531_v52  ;;  %v200_v52 = vld [vmem:[#allocation4 + $0x38] sm:$0xff]  ;;  %v198_v54 = vld [vmem:[#allocation4 + $0x28] sm:$0xff] }
 0x2df   :  { %v465_v27 = vpop.f32.mrf.mxu3 }
 0x2e0   :  { %v466_v38 = vadd.f32 %v465_v27, %v384_v20 }
 0x2e2   :  { %v3362_v49 = vadd.f32 %v477_v26, %v466_v38  ;;  %v3382_v38 = vld [vmem:[#allocation4 + $0x50] sm:$0xff] }
 0x2e3   :  { %653 = vmatpush.msrb.mxu2 %v3382_v38 }
 0x2e4   :  { %v533_v56 = vmul.f32 %v3362_v49, %v3362_v49  ;;  %v513_v3 = vadd.f32 %v512_v55, %v3362_v49 }
 0x2e6   :  { %v555_v7 = vadd.f32 %v554_v62, %v533_v56 }
 0x2e7   :  { %v468_v40 = vpop.f32.mrf.mxu3 }
 0x2e8   :  { %v469_v44 = vadd.f32 %v468_v40, %v387_v34  ;;  %v3385_v40 = vld [vmem:[#allocation4 + $0x40] sm:$0xff] }
 0x2e9   :  { %654 = vmatpush.msrb.mxu2 %v3385_v40 }
 0x2ea   :  { %v3367_v53 = vadd.f32 %v477_v26, %v469_v44 }
 0x2eb   :  { %655 = vmatpush.msrb.mxu2 %v3388_v42 }
 0x2ec   :  { %v535_v4 = vmul.f32 %v3367_v53, %v3367_v53  ;;  %v514_v8 = vadd.f32 %v513_v3, %v3367_v53  ;;  %v614_v3 = vld [vmem:[#allocation4 + $0x7] ss:$0 sm:$0xff] }
 0x2ed   :  { %656 = vmatpush.msrb.mxu2 %v3391_v45 }
 0x2ee   :  { %v556_v10 = vadd.f32 %v555_v7, %v535_v4 }
 0x2ef   :  { %v470_v60 = vpop.f32.mrf.mxu3 }
 0x2f0   :  { %v471_v6 = vadd.f32 %v470_v60, %v389_v58 }
 0x2f2   :  { %v3376_v9 = vadd.f32 %v477_v26, %v471_v6 }
 0x2f4   :  { %v515_v12 = vadd.f32 %v514_v8, %v3376_v9  ;;  %v537_v14 = vmul.f32 %v3376_v9, %v3376_v9 }
 0x2f6   :  { %v516_v15 = vrot.slane %v515_v12, 4  ;;  %v557_v16 = vadd.f32 %v556_v10, %v537_v14  ;;  %v627_v10 = vld [vmem:[#allocation4 + $0x10] ss:$0 sm:$0xff] }
 0x2f8   :  { %v517_v18 = vadd.f32 %v516_v15, %v515_v12  ;;  %v558_v19 = vrot.slane %v557_v16, 4 }
 0x2fa   :  { %v518_v20 = vrot.slane %v517_v18, 2  ;;  %v559_v22 = vadd.f32 %v558_v19, %v557_v16 }
 0x2fc   :  { %v519_v23 = vadd.f32 %v518_v20, %v517_v18  ;;  %v560_v24 = vrot.slane %v559_v22, 2 }
 0x2fe   :  { %v520_v25 = vrot.slane %v519_v23, 1  ;;  %v561_v27 = vadd.f32 %v560_v24, %v559_v22 }
 0x300   :  { %v562_v28 = vrot.slane %v561_v27, 1  ;;  %v521_v29 = vadd.f32 %v520_v25, %v519_v23 }
 0x302   :  { %v563_v26 = vadd.f32 %v562_v28, %v561_v27 }
 0x304   :  { %v566_v30 = vsel %vm564_vm6, %v521_v29, %v563_v26 }
 0x305   :  { %603 = vmatmul.f32.vlgmr.msra.gmra.mxu2 %v566_v30 }
 0x306   :  { %673 = vmatpush.msra.mxu2 %v204_v47 }
 0x308   :  { %674 = vmatpush.msra.mxu2 %v202_v50 }
 0x30a   :  { %675 = vmatpush.msra.mxu2 %v200_v52 }
 0x30c   :  { %676 = vmatpush.msra.mxu2 %v198_v54 }
 0x348   :  { %v584_v32 = vpop.f32.mrf.mxu2 }
 0x388   :  { %v604_v37 = vpop.f32.mrf.mxu2 }
 0x389   :  { %v605_v34 = vadd.f32 %v604_v37, %v584_v32 }
 0x38b   :  { %v607_v13 = vmul.f32 0.001953125, %v605_v34 }
 0x38d   :  { %v608_v39 = vmul.f32 %v607_v13, %v607_v13 }
 0x38f   :  { %v610_v41 = vrot.slane %v608_v39, 7 }
 0x391   :  { %v612_v44 = vsub.f32 %v607_v13, %v610_v41 }
 0x393   :  { %v613_v46 = vmax.f32 %v612_v44, 0.0 }
 0x395   :  { %v615_v51 = vadd.f32 1e-05, %v613_v46 }
 0x397   :  { %3087 = vrsqrt.f32 %v615_v51  ;;  %vm622_vm8 = vweird.f32 %v615_v51 }
 0x39d   :  { %v3088_v55 = vpop.eup %3087 }
 0x39e   :  { %v617_v56 = vmul.f32 %v3088_v55, %v615_v51  ;;  %vm623_vm7 = vweird.f32 %v3088_v55 }
 0x39f   :  { %vm624_vm9 = vmor %vm622_vm8, %vm623_vm7 }
 0x3a0   :  { %v618_v58 = vmul.f32 %v3088_v55, %v617_v56 }
 0x3a2   :  { %v619_v60 = vmul.f32 0.5, %v618_v58 }
 0x3a4   :  { %v620_v62 = vsub.f32 1.5, %v619_v60 }
 0x3a6   :  { %v621_v4 = vmul.f32 %v3088_v55, %v620_v62 }
 0x3a8   :  { %v625_v6 = vsel %vm624_vm9, %v3088_v55, %v621_v4 }
 0x3a9   :  { %v626_v7 = vmul.f32 %v625_v6, %v614_v3 }
 0x3ab   :  { %v629_v8 = vrot.slane %v626_v7, 1 }
 0x3ad   :  { %v631_v12 = vmul.f32 %v629_v8, %v607_v13 }
 0x3af   :  { %v632_v14 = vsub.f32 %v627_v10, %v631_v12 }
 0x3b1   :  { %v634_v15 = vrot.slane %v632_v14, 7 }
 0x3b3   :  { %v636_v16 = vsel %vm564_vm6, %v629_v8, %v634_v15 }
 0x3b4   :  { %2518 = vmatmul.msk.f32.vlgmr.msrb.gmra.mxu2 %vm637_vm10, %v636_v16 }
 0x3bc   :  { %2519 = vmatmul.msk.f32.vlgmr.msra.gmra.mxu2 %vm637_vm10, %v636_v16 }
 0x437   :  { %v658_v18 = vpop.f32.mrf.mxu2 }
 0x438   :  { %v681_v19 = vperm.slane %v658_v18, 0  ;;  %v699_v20 = vperm.slane %v658_v18, 1 }
 0x43a   :  { %v695_v22 = vmul.f32 %v681_v19, %v3324_v21  ;;  %v697_v23 = vmul.f32 %v681_v19, %v3333_v33  ;;  %v691_v24 = vmul.f32 %v681_v19, %v3312_v11  ;;  %v693_v25 = vmul.f32 %v681_v19, %v3319_v17 }
 0x43b   :  { %v687_v28 = vmul.f32 %v681_v19, %v3300_v61  ;;  %v689_v29 = vmul.f32 %v681_v19, %v3304_v5  ;;  %v683_v34 = vmul.f32 %v681_v19, %v3298_v59  ;;  %v685_v13 = vmul.f32 %v681_v19, %v3296_v57 }
 0x43c   :  { %v713_v27 = vadd.f32 %v699_v20, %v695_v22  ;;  %v715_v26 = vadd.f32 %v699_v20, %v697_v23  ;;  %v709_v30 = vadd.f32 %v699_v20, %v691_v24  ;;  %v711_v32 = vadd.f32 %v699_v20, %v693_v25 }
 0x43d   :  { %v705_v33 = vadd.f32 %v699_v20, %v687_v28  ;;  %v707_v41 = vadd.f32 %v699_v20, %v689_v29  ;;  %v701_v7 = vadd.f32 %v699_v20, %v683_v34 }
 0x43e   :  { %v729_v39 = vmax.f32 %v713_v27, 0.0  ;;  %v731_v44 = vmax.f32 %v715_v26, 0.0  ;;  %v725_v17 = vmax.f32 %v709_v30, 0.0  ;;  %v727_v46 = vmax.f32 %v711_v32, 0.0 }
 0x43f   :  { %v678_v37 = vpop.f32.mrf.mxu2  ;;  %v721_v12 = vmax.f32 %v705_v33, 0.0  ;;  %v723_v14 = vmax.f32 %v707_v41, 0.0  ;;  %v717_v32 = vmax.f32 %v701_v7, 0.0 }
 0x440   :  { %v682_v21 = vperm.slane %v678_v37, 0  ;;  %v700_v11 = vperm.slane %v678_v37, 1 }
 0x442   :  { %v696_v61 = vmul.f32 %v682_v21, %v3367_v53  ;;  %v698_v5 = vmul.f32 %v682_v21, %v3376_v9  ;;  %v692_v47 = vmul.f32 %v682_v21, %v3357_v43  ;;  %v694_v50 = vmul.f32 %v682_v21, %v3362_v49 }
 0x443   :  { %v688_v59 = vmul.f32 %v682_v21, %v3345_v36  ;;  %v690_v57 = vmul.f32 %v682_v21, %v3349_v48  ;;  %v684_v51 = vmul.f32 %v682_v21, %v3343_v35  ;;  %v686_v52 = vmul.f32 %v682_v21, %v3341_v31 }
 0x444   :  { %v714_v54 = vadd.f32 %v700_v11, %v696_v61  ;;  %v716_v55 = vadd.f32 %v700_v11, %v698_v5  ;;  %v710_v56 = vadd.f32 %v700_v11, %v692_v47  ;;  %v712_v58 = vadd.f32 %v700_v11, %v694_v50 }
 0x445   :  { %v706_v60 = vadd.f32 %v700_v11, %v688_v59  ;;  %v708_v53 = vadd.f32 %v700_v11, %v690_v57  ;;  %v702_v62 = vadd.f32 %v700_v11, %v684_v51  ;;  %v704_v9 = vadd.f32 %v700_v11, %v686_v52  ;;  %v2714_v51 = vld [vmem:[#allocation2 + $0x1b0] sm:$0xf]  ;;  %v3022_v52 = vld [vmem:[#allocation2 + $0x1b4] sm:$0xf0] }
 0x446   :  { %v730_v3 = vmax.f32 %v714_v54, 0.0  ;;  %v732_v43 = vmax.f32 %v716_v55, 0.0  ;;  %v726_v4 = vmax.f32 %v710_v56, 0.0  ;;  %v728_v49 = vmax.f32 %v712_v58, 0.0  ;;  %v2778_v54 = vld [vmem:[#allocation2 + $0x230] sm:$0xf] }
 0x447   :  { %v722_v6 = vmax.f32 %v706_v60, 0.0  ;;  %v724_v36 = vmax.f32 %v708_v53, 0.0  ;;  %v703_v48 = vadd.f32 %v699_v20, %v685_v13  ;;  %v718_v15 = vmax.f32 %v702_v62, 0.0  ;;  %v3038_v56 = vld [vmem:[#allocation2 + $0x234] sm:$0xf0] }
 0x448   :  { %v739_v8 = vpack.c.bf16 %v730_v3, %v729_v39  ;;  %v740_v35 = vpack.c.bf16 %v732_v43, %v731_v44  ;;  %v737_v10 = vpack.c.bf16 %v726_v4, %v725_v17  ;;  %v738_v31 = vpack.c.bf16 %v728_v49, %v727_v46  ;;  %v2706_v58 = vld [vmem:[#allocation2 + $0x1a0] sm:$0xf]  ;;  %v3020_v60 = vld [vmem:[#allocation2 + $0x1a4] sm:$0xf0]  ;;  %v2698_v4 = vld [vmem:[#allocation2 + $0x190] sm:$0xf] }
 0x449   :  { %v720_v16 = vmax.f32 %v704_v9, 0.0  ;;  %v735_v27 = vpack.c.bf16 %v722_v6, %v721_v12  ;;  %v736_v28 = vpack.c.bf16 %v724_v36, %v723_v14  ;;  %v719_v37 = vmax.f32 %v703_v48, 0.0  ;;  %v2770_v62 = vld [vmem:[#allocation2 + $0x220] sm:$0xf]  ;;  %v3036_v9 = vld [vmem:[#allocation2 + $0x224] sm:$0xf0] }
 0x44a   :  { %v761_v18 = vunpack.c.l.b16 %v739_v8  ;;  %v763_v19 = vunpack.c.l.b16 %v740_v35  ;;  %v762_v22 = vunpack.c.h.b16 %v739_v8  ;;  %v764_v23 = vunpack.c.h.b16 %v740_v35  ;;  %v3018_v49 = vld [vmem:[#allocation2 + $0x194] sm:$0xf0]  ;;  %v2762_v6 = vld [vmem:[#allocation2 + $0x210] sm:$0xf]  ;;  %v2690_v48 = vld [vmem:[#allocation2 + $0x180] sm:$0xf] }
 0x44b   :  { %v757_v24 = vunpack.c.l.b16 %v737_v10  ;;  %v759_v25 = vunpack.c.l.b16 %v738_v31  ;;  %v758_v20 = vunpack.c.h.b16 %v737_v10  ;;  %v760_v30 = vunpack.c.h.b16 %v738_v31  ;;  %v3034_v36 = vld [vmem:[#allocation2 + $0x214] sm:$0xf0]  ;;  %v3016_v8 = vld [vmem:[#allocation2 + $0x184] sm:$0xf0]  ;;  %v2754_v35 = vld [vmem:[#allocation2 + $0x200] sm:$0xf] }
 0x44c   :  { %v3413_v29 = vpack.c.b16 %v763_v19, %v761_v18  ;;  %v3415_v26 = vpack.c.b16 %v764_v23, %v762_v22  ;;  %v753_v34 = vunpack.c.l.b16 %v735_v27  ;;  %v755_v13 = vunpack.c.l.b16 %v736_v28  ;;  %v3032_v10 = vld [vmem:[#allocation2 + $0x204] sm:$0xf0]  ;;  %v2682_v14 = vld [vmem:[#allocation2 + $0x170] sm:$0xf]  ;;  %v3030_v19 = vld [vmem:[#allocation2 + $0x1f4] sm:$0xf0] }
 0x44d   :  { %v733_v21 = vpack.c.bf16 %v718_v15, %v717_v32  ;;  %v734_v39 = vpack.c.bf16 %v720_v16, %v719_v37  ;;  %v3419_v33 = vpack.c.b16 %v759_v25, %v757_v24  ;;  %v3421_v41 = vpack.c.b16 %v760_v30, %v758_v20  ;;  %v3014_v15 = vld [vmem:[#allocation2 + $0x174] sm:$0xf0]  ;;  %v2746_v16 = vld [vmem:[#allocation2 + $0x1f0] sm:$0xf]  ;;  %v2674_v22 = vld [vmem:[#allocation2 + $0x160] sm:$0xf] }
 0x44e   :  { %785 = vmatpush.bf16.msra.mxu0 %v3413_v29  ;;  %814 = vmatpush.bf16.msra.mxu1 %v3415_v26  ;;  %v754_v11 = vunpack.c.h.b16 %v735_v27  ;;  %v756_v44 = vunpack.c.h.b16 %v736_v28  ;;  %v3425_v17 = vpack.c.b16 %v755_v13, %v753_v34  ;;  %v2715_v55 = vor.u32 %v3022_v52, %v2714_v51  ;;  %v3012_v23 = vld [vmem:[#allocation2 + $0x164] sm:$0xf0]  ;;  %v2738_v25 = vld [vmem:[#allocation2 + $0x1e0] sm:$0xf]  ;;  %v2666_v20 = vld [vmem:[#allocation2 + $0x150] sm:$0xf] }
 0x44f   :  { %v749_v46 = vunpack.c.l.b16 %v733_v21  ;;  %v751_v5 = vunpack.c.l.b16 %v734_v39  ;;  %v750_v47 = vunpack.c.h.b16 %v733_v21  ;;  %v752_v50 = vunpack.c.h.b16 %v734_v39  ;;  %v3028_v27 = vld [vmem:[#allocation2 + $0x1e4] sm:$0xf0]  ;;  %v3010_v30 = vld [vmem:[#allocation2 + $0x154] sm:$0xf0]  ;;  %v2730_v37 = vld [vmem:[#allocation2 + $0x1d0] sm:$0xf] }
 0x450   :  { %v3427_v61 = vpack.c.b16 %v756_v44, %v754_v11  ;;  %v2779_v53 = vor.u32 %v3038_v56, %v2778_v54  ;;  %v2707_v3 = vor.u32 %v3020_v60, %v2706_v58  ;;  %v2771_v43 = vor.u32 %v3036_v9, %v2770_v62  ;;  %v3026_v34 = vld [vmem:[#allocation2 + $0x1d4] sm:$0xf0]  ;;  %v2658_v13 = vld [vmem:[#allocation2 + $0x140] sm:$0xf]  ;;  %v3008_v21 = vld [vmem:[#allocation2 + $0x144] sm:$0xf0] }
 0x451   :  { %v3431_v59 = vpack.c.b16 %v751_v5, %v749_v46  ;;  %v3433_v57 = vpack.c.b16 %v752_v50, %v750_v47  ;;  %v2763_v7 = vor.u32 %v3034_v36, %v2762_v6  ;;  %v2691_v31 = vor.u32 %v3016_v8, %v2690_v48  ;;  %v2722_v11 = vld [vmem:[#allocation2 + $0x1c0] sm:$0xf]  ;;  %v3024_v44 = vld [vmem:[#allocation2 + $0x1c4] sm:$0xf0]  ;;  %v3021_v47 = vld [vmem:[#allocation2 + $0x1b4] sm:$0xf] }
 0x452   :  { %786 = vmatpush.bf16.msra.mxu0 %v3419_v33  ;;  %815 = vmatpush.bf16.msra.mxu1 %v3421_v41  ;;  %v2755_v12 = vor.u32 %v3032_v10, %v2754_v35  ;;  %v2683_v18 = vor.u32 %v3014_v15, %v2682_v14  ;;  %v2747_v24 = vor.u32 %v3030_v19, %v2746_v16  ;;  %v2716_v50 = vld [vmem:[#allocation2 + $0x1b8] sm:$0xf0]  ;;  %v3037_v51 = vld [vmem:[#allocation2 + $0x234] sm:$0xf]  ;;  %v2708_v56 = vld [vmem:[#allocation2 + $0x1a8] sm:$0xf0] }
 0x453   :  { %v2675_v28 = vor.u32 %v3012_v23, %v2674_v22  ;;  %v2739_v32 = vor.u32 %v3028_v27, %v2738_v25  ;;  %v2731_v39 = vor.u32 %v3026_v34, %v2730_v37  ;;  %v2659_v46 = vor.u32 %v3008_v21, %v2658_v13  ;;  %v2780_v54 = vld [vmem:[#allocation2 + $0x238] sm:$0xf0]  ;;  %v2772_v60 = vld [vmem:[#allocation2 + $0x228] sm:$0xf0]  ;;  %v3017_v62 = vld [vmem:[#allocation2 + $0x194] sm:$0xf] }
 0x454   :  { %v2723_v5 = vor.u32 %v3024_v44, %v2722_v11  ;;  %v2719_v52 = vor.u32 %v3021_v47, %v2716_v50  ;;  %v2783_v58 = vor.u32 %v3037_v51, %v2780_v54  ;;  %v2700_v9 = vld [vmem:[#allocation2 + $0x198] sm:$0xf0]  ;;  %v3015_v35 = vld [vmem:[#allocation2 + $0x184] sm:$0xf]  ;;  %v2692_v10 = vld [vmem:[#allocation2 + $0x188] sm:$0xf0] }
 0x455   :  { %v2764_v6 = vld [vmem:[#allocation2 + $0x218] sm:$0xf0]  ;;  %v2703_v48 = vor.u32 %v3017_v62, %v2700_v9  ;;  %v2695_v14 = vor.u32 %v3015_v35, %v2692_v10  ;;  %v2578_v16 = vld [vmem:[#allocation2 + $0xa0] sm:$0xf]  ;;  %v3004_v23 = vld [vmem:[#allocation2 + $0x124] sm:$0xf0] }
 0x456   :  { %787 = vmatpush.bf16.msra.mxu0 %v3425_v17  ;;  %816 = vmatpush.bf16.msra.mxu1 %v3427_v61  ;;  %v2642_v19 = vld [vmem:[#allocation2 + $0x120] sm:$0xf]  ;;  %v2684_v25 = vld [vmem:[#allocation2 + $0x178] sm:$0xf0]  ;;  %v2986_v34 = vld [vmem:[#allocation2 + $0x94] sm:$0xf0] }
 0x457   :  { %v2643_v27 = vor.u32 %v3004_v23, %v2642_v19  ;;  %v3002_v13 = vld [vmem:[#allocation2 + $0x114] sm:$0xf0]  ;;  %v3011_v11 = vld [vmem:[#allocation2 + $0x164] sm:$0xf]  ;;  %v2676_v44 = vld [vmem:[#allocation2 + $0x168] sm:$0xf0] }
 0x458   :  { %v2740_v47 = vld [vmem:[#allocation2 + $0x1e8] sm:$0xf0]  ;;  %v2562_v50 = vld [vmem:[#allocation2 + $0x80] sm:$0xf]  ;;  %v2984_v51 = vld [vmem:[#allocation2 + $0x84] sm:$0xf0] }
 0x459   :  { %v2626_v54 = vld [vmem:[#allocation2 + $0x100] sm:$0xf]  ;;  %v2724_v35 = vld [vmem:[#allocation2 + $0x1c8] sm:$0xf0]  ;;  %v2538_v19 = vld [vmem:[#allocation2 + $0x50] sm:$0xf] }
 0x45a   :  { %788 = vmatpush.bf16.msra.mxu0 %v3431_v59  ;;  %817 = vmatpush.bf16.msra.mxu1 %v3433_v57  ;;  %v2546_v10 = vld [vmem:[#allocation2 + $0x60] sm:$0xf]  ;;  %v2602_v23 = vld [vmem:[#allocation2 + $0xd0] sm:$0xf] }
 0x45d   :  { %2520 = vmatmul.msk.bf16.vlgmr.msra.gmra.mxu0 %vm262_vm5, %v3250_v63  ;;  %2524 = vmatmul.msk.bf16.vlgmr.msra.gmra.mxu1 %vm262_vm5, %v3250_v63  ;;  %v2699_v63 = vor.u32 %v3018_v49, %v2698_v4  ;;  %v2650_v4 = vld [vmem:[#allocation2 + $0x130] sm:$0xf]  ;;  %v3033_v49 = vld [vmem:[#allocation2 + $0x214] sm:$0xf] }
 0x45e   :  { %1336 = vmatpush.bf16.msrb.mxu0 %v2715_v55  ;;  %1365 = vmatpush.bf16.msrb.mxu1 %v2779_v53  ;;  %v3019_v55 = vld [vmem:[#allocation2 + $0x1a4] sm:$0xf]  ;;  %v2767_v8 = vor.u32 %v3033_v49, %v2764_v6  ;;  %v2998_v6 = vld [vmem:[#allocation2 + $0xf4] sm:$0xf0] }
 0x45f   :  { %v2711_v53 = vor.u32 %v3019_v55, %v2708_v56  ;;  %v3000_v55 = vld [vmem:[#allocation2 + $0x104] sm:$0xf0]  ;;  %v3009_v56 = vld [vmem:[#allocation2 + $0x154] sm:$0xf] }
 0x460   :  { %v2627_v62 = vor.u32 %v3000_v55, %v2626_v54  ;;  %v2989_v55 = vld [vmem:[#allocation2 + $0xb4] sm:$0xf] }
 0x462   :  { %1337 = vmatpush.bf16.msrb.mxu0 %v2707_v3  ;;  %1366 = vmatpush.bf16.msrb.mxu1 %v2771_v43  ;;  %v2586_v3 = vld [vmem:[#allocation2 + $0xb0] sm:$0xf]  ;;  %v2990_v43 = vld [vmem:[#allocation2 + $0xb4] sm:$0xf0] }
 0x463   :  { %v2587_v36 = vor.u32 %v2990_v43, %v2586_v3  ;;  %v2554_v3 = vld [vmem:[#allocation2 + $0x70] sm:$0xf]  ;;  %v2982_v43 = vld [vmem:[#allocation2 + $0x74] sm:$0xf0] }
 0x464   :  { %v2555_v49 = vor.u32 %v2982_v43, %v2554_v3 }
 0x465   :  { %1278 = vmatpush.bf16.msra.mxu3 %v2587_v36  ;;  %v3007_v36 = vld [vmem:[#allocation2 + $0x144] sm:$0xf] }
 0x466   :  { %1338 = vmatpush.bf16.msrb.mxu0 %v2699_v63  ;;  %1367 = vmatpush.bf16.msrb.mxu1 %v2763_v7  ;;  %v3006_v63 = vld [vmem:[#allocation2 + $0x134] sm:$0xf0] }
 0x467   :  { %v2651_v7 = vor.u32 %v3006_v63, %v2650_v4  ;;  %v2618_v4 = vld [vmem:[#allocation2 + $0xf0] sm:$0xf]  ;;  %v2660_v63 = vld [vmem:[#allocation2 + $0x148] sm:$0xf0] }
 0x469   :  { %1307 = vmatpush.bf16.msrb.mxu2 %v2651_v7  ;;  %v2619_v7 = vor.u32 %v2998_v6, %v2618_v4 }
 0x46a   :  { %1339 = vmatpush.bf16.msrb.mxu0 %v2691_v31  ;;  %1368 = vmatpush.bf16.msrb.mxu1 %v2755_v12  ;;  %v3031_v31 = vld [vmem:[#allocation2 + $0x204] sm:$0xf]  ;;  %v2756_v12 = vld [vmem:[#allocation2 + $0x208] sm:$0xf0] }
 0x46b   :  { %v2759_v15 = vor.u32 %v3031_v31, %v2756_v12  ;;  %v2980_v12 = vld [vmem:[#allocation2 + $0x64] sm:$0xf0] }
 0x46d   :  { %2521 = vmatmul.msk.bf16.gmra.mxu0 %vm262_vm5, %v3258_v0  ;;  %2525 = vmatmul.msk.bf16.gmra.mxu1 %vm262_vm5, %v3258_v0  ;;  %v2667_v0 = vor.u32 %v3010_v30, %v2666_v20  ;;  %v3029_v20 = vld [vmem:[#allocation2 + $0x1f4] sm:$0xf]  ;;  %v2748_v30 = vld [vmem:[#allocation2 + $0x1f8] sm:$0xf0] }
 0x46e   :  { %1340 = vmatpush.bf16.msrb.mxu0 %v2683_v18  ;;  %1369 = vmatpush.bf16.msrb.mxu1 %v2747_v24  ;;  %v2988_v18 = vld [vmem:[#allocation2 + $0xa4] sm:$0xf0]  ;;  %v3013_v24 = vld [vmem:[#allocation2 + $0x174] sm:$0xf]  ;;  %v2751_v37 = vor.u32 %v3029_v20, %v2748_v30  ;;  %v2594_v30 = vld [vmem:[#allocation2 + $0xc0] sm:$0xf] }
 0x46f   :  { %v2579_v22 = vor.u32 %v2988_v18, %v2578_v16  ;;  %1308 = vmatpush.bf16.msrb.mxu2 %v2643_v27  ;;  %v2547_v16 = vor.u32 %v2980_v12, %v2546_v10  ;;  %v2976_v20 = vld [vmem:[#allocation2 + $0x44] sm:$0xf0]  ;;  %v2564_v10 = vld [vmem:[#allocation2 + $0x88] sm:$0xf0] }
 0x471   :  { %1279 = vmatpush.bf16.msra.mxu3 %v2579_v22  ;;  %v2978_v22 = vld [vmem:[#allocation2 + $0x54] sm:$0xf0] }
 0x472   :  { %1341 = vmatpush.bf16.msrb.mxu0 %v2675_v28  ;;  %1370 = vmatpush.bf16.msrb.mxu1 %v2739_v32  ;;  %v2687_v28 = vor.u32 %v3013_v24, %v2684_v25  ;;  %v2570_v32 = vld [vmem:[#allocation2 + $0x90] sm:$0xf]  ;;  %v2539_v24 = vor.u32 %v2978_v22, %v2538_v19  ;;  %v2994_v25 = vld [vmem:[#allocation2 + $0xd4] sm:$0xf0] }
 0x473   :  { %v2571_v21 = vor.u32 %v2986_v34, %v2570_v32  ;;  %v2603_v27 = vor.u32 %v2994_v25, %v2602_v23 }
 0x475   :  { %1280 = vmatpush.bf16.msra.mxu3 %v2571_v21 }
 0x476   :  { %1342 = vmatpush.bf16.msrb.mxu0 %v2667_v0  ;;  %1371 = vmatpush.bf16.msrb.mxu1 %v2731_v39  ;;  %v2634_v0 = vld [vmem:[#allocation2 + $0x110] sm:$0xf] }
 0x477   :  { %v2635_v39 = vor.u32 %v3002_v13, %v2634_v0 }
 0x479   :  { %1309 = vmatpush.bf16.msrb.mxu2 %v2635_v39 }
 0x47a   :  { %1343 = vmatpush.bf16.msrb.mxu0 %v2659_v46  ;;  %1372 = vmatpush.bf16.msrb.mxu1 %v2723_v5  ;;  %v3027_v46 = vld [vmem:[#allocation2 + $0x1e4] sm:$0xf]  ;;  %v2679_v5 = vor.u32 %v3011_v11, %v2676_v44 }
 0x47d   :  { %2522 = vmatmul.msk.bf16.gmra.mxu0 %vm262_vm5, %v3265_v1  ;;  %2526 = vmatmul.msk.bf16.gmra.mxu1 %vm262_vm5, %v3265_v1  ;;  %v3035_v1 = vld [vmem:[#allocation2 + $0x224] sm:$0xf] }
 0x47e   :  { %1452 = vmatpush.bf16.msra.mxu0 %v2719_v52  ;;  %1481 = vmatpush.bf16.msra.mxu1 %v2783_v58  ;;  %v2743_v52 = vor.u32 %v3027_v46, %v2740_v47  ;;  %v2563_v58 = vor.u32 %v2984_v51, %v2562_v50 }
 0x47f   :  { %1310 = vmatpush.bf16.msrb.mxu2 %v2627_v62 }
 0x480   :  { %1281 = vmatpush.bf16.msra.mxu3 %v2563_v58 }
 0x482   :  { %1453 = vmatpush.bf16.msra.mxu0 %v2711_v53  ;;  %v2732_v53 = vld [vmem:[#allocation2 + $0x1d8] sm:$0xf0] }
 0x483   :  { %1311 = vmatpush.bf16.msrb.mxu2 %v2619_v7  ;;  %v3001_v7 = vld [vmem:[#allocation2 + $0x114] sm:$0xf] }
 0x484   :  { %1282 = vmatpush.bf16.msra.mxu3 %v2555_v49 }
 0x486   :  { %1454 = vmatpush.bf16.msra.mxu0 %v2703_v48  ;;  %v2663_v48 = vor.u32 %v3007_v36, %v2660_v63  ;;  %v2985_v63 = vld [vmem:[#allocation2 + $0x94] sm:$0xf] }
 0x488   :  { %1283 = vmatpush.bf16.msra.mxu3 %v2547_v16  ;;  %v2999_v16 = vld [vmem:[#allocation2 + $0x104] sm:$0xf] }
 0x48a   :  { %1455 = vmatpush.bf16.msra.mxu0 %v2695_v14  ;;  %v2610_v14 = vld [vmem:[#allocation2 + $0xe0] sm:$0xf] }
 0x48c   :  { %1284 = vmatpush.bf16.msra.mxu3 %v2539_v24 }
 0x48d   :  { %2523 = vmatmul.msk.bf16.gmra.mxu0 %vm262_vm5, %v3272_v2  ;;  %2527 = vmatmul.msk.bf16.gmra.mxu1 %vm262_vm5, %v3272_v2  ;;  %v2775_v2 = vor.u32 %v3035_v1, %v2772_v60  ;;  %v2668_v1 = vld [vmem:[#allocation2 + $0x158] sm:$0xf0]  ;;  %v3025_v60 = vld [vmem:[#allocation2 + $0x1d4] sm:$0xf] }
 0x48e   :  { %1456 = vmatpush.bf16.msra.mxu0 %v2687_v28  ;;  %v2671_v9 = vor.u32 %v3009_v56, %v2668_v1  ;;  %v2530_v28 = vld [vmem:[#allocation2 + $0x40] sm:$0xf]  ;;  %v3005_v56 = vld [vmem:[#allocation2 + $0x134] sm:$0xf]  ;;  %v2652_v1 = vld [vmem:[#allocation2 + $0x138] sm:$0xf0] }
 0x48f   :  { %1482 = vmatpush.bf16.msra.mxu1 %v2775_v2  ;;  %v2735_v2 = vor.u32 %v3025_v60, %v2732_v53  ;;  %v2531_v32 = vor.u32 %v2976_v20, %v2530_v28  ;;  %v2987_v60 = vld [vmem:[#allocation2 + $0xa4] sm:$0xf]  ;;  %v2580_v53 = vld [vmem:[#allocation2 + $0xa8] sm:$0xf0]  ;;  %v2655_v62 = vor.u32 %v3005_v56, %v2652_v1  ;;  %v2981_v28 = vld [vmem:[#allocation2 + $0x74] sm:$0xf] }
 0x490   :  { %v2583_v3 = vor.u32 %v2987_v60, %v2580_v53  ;;  %v2556_v20 = vld [vmem:[#allocation2 + $0x78] sm:$0xf0] }
 0x491   :  { %1285 = vmatpush.bf16.msra.mxu3 %v2531_v32  ;;  %v2559_v32 = vor.u32 %v2981_v28, %v2556_v20  ;;  %v2604_v56 = vld [vmem:[#allocation2 + $0xd8] sm:$0xf0]  ;;  %v3102_v20 = vld [vmem:[#allocation4 + $0xf0] sm:$0xff] }
 0x492   :  { %1457 = vmatpush.bf16.msra.mxu0 %v2679_v5 }
 0x493   :  { %1483 = vmatpush.bf16.msra.mxu1 %v2767_v8  ;;  %v3023_v8 = vld [vmem:[#allocation2 + $0x1c4] sm:$0xf] }
 0x494   :  { %v2727_v31 = vor.u32 %v3023_v8, %v2724_v35  ;;  %v2636_v8 = vld [vmem:[#allocation2 + $0x118] sm:$0xf0]  ;;  %v2983_v35 = vld [vmem:[#allocation2 + $0x84] sm:$0xf] }
 0x495   :  { %v2567_v23 = vor.u32 %v2983_v35, %v2564_v10 }
 0x496   :  { %1458 = vmatpush.bf16.msra.mxu0 %v2671_v9  ;;  %v3003_v9 = vld [vmem:[#allocation2 + $0x124] sm:$0xf] }
 0x497   :  { %1484 = vmatpush.bf16.msra.mxu1 %v2759_v15  ;;  %v2996_v15 = vld [vmem:[#allocation2 + $0xe4] sm:$0xf0] }
 0x498   :  { %v2611_v18 = vor.u32 %v2996_v15, %v2610_v14  ;;  %v2639_v15 = vor.u32 %v3001_v7, %v2636_v8  ;;  %v3093_v7 = vld [vmem:[#allocation4 + $0x250] sm:$0xff] }
 0x49a   :  { %1459 = vmatpush.bf16.msra.mxu0 %v2663_v48  ;;  %1312 = vmatpush.bf16.msrb.mxu2 %v2611_v18  ;;  %v2628_v18 = vld [vmem:[#allocation2 + $0x108] sm:$0xf0] }
 0x49b   :  { %1485 = vmatpush.bf16.msra.mxu1 %v2751_v37  ;;  %v2992_v37 = vld [vmem:[#allocation2 + $0xc4] sm:$0xf0]  ;;  %v2631_v24 = vor.u32 %v2999_v16, %v2628_v18 }
 0x49c   :  { %v2595_v34 = vor.u32 %v2992_v37, %v2594_v30  ;;  %v2997_v30 = vld [vmem:[#allocation2 + $0xf4] sm:$0xf]  ;;  %v2620_v37 = vld [vmem:[#allocation2 + $0xf8] sm:$0xf0] }
 0x49d   :  { %1344 = vmatmul.bf16.vlgmr.msrb.gmra.mxu0 %v3431_v59  ;;  %1373 = vmatmul.bf16.vlgmr.msrb.gmra.mxu1 %v3433_v57 }
 0x49e   :  { %1313 = vmatpush.bf16.msrb.mxu2 %v2603_v27 }
 0x49f   :  { %1486 = vmatpush.bf16.msra.mxu1 %v2743_v52 }
 0x4a2   :  { %1314 = vmatpush.bf16.msrb.mxu2 %v2595_v34  ;;  %v2623_v34 = vor.u32 %v2997_v30, %v2620_v37  ;;  %v3103_v30 = vld [vmem:[#allocation4 + $0x200] sm:$0xff]  ;;  %v3105_v37 = vld [vmem:[#allocation4 + $0x1f0] sm:$0xff] }
 0x4a3   :  { %1487 = vmatpush.bf16.msra.mxu1 %v2735_v2  ;;  %v2644_v2 = vld [vmem:[#allocation2 + $0x128] sm:$0xf0] }
 0x4a4   :  { %v2647_v4 = vor.u32 %v3003_v9, %v2644_v2  ;;  %v2991_v9 = vld [vmem:[#allocation2 + $0xc4] sm:$0xf]  ;;  %v2596_v2 = vld [vmem:[#allocation2 + $0xc8] sm:$0xf0] }
 0x4a6   :  { %1423 = vmatpush.bf16.msra.mxu2 %v2655_v62 }
 0x4a7   :  { %1488 = vmatpush.bf16.msra.mxu1 %v2727_v31 }
 0x4aa   :  { %1424 = vmatpush.bf16.msra.mxu2 %v2647_v4 }
 0x4ad   :  { %1349 = vmatmul.bf16.gmra.mxu0 %v3425_v17  ;;  %1378 = vmatmul.bf16.gmra.mxu1 %v3427_v61 }
 0x4ae   :  { %1425 = vmatpush.bf16.msra.mxu2 %v2639_v15  ;;  %v3098_v15 = vld [vmem:[#allocation4 + $0x110] sm:$0xff] }
 0x4b2   :  { %1426 = vmatpush.bf16.msra.mxu2 %v2631_v24  ;;  %v3100_v24 = vld [vmem:[#allocation4 + $0x100] sm:$0xff] }
 0x4b6   :  { %1427 = vmatpush.bf16.msra.mxu2 %v2623_v34  ;;  %v3106_v34 = vld [vmem:[#allocation4 + $0xd0] sm:$0xff] }
 0x4bd   :  { %1354 = vmatmul.bf16.gmra.mxu0 %v3419_v33  ;;  %1383 = vmatmul.bf16.gmra.mxu1 %v3421_v41 }
 0x4cd   :  { %1359 = vmatmul.bf16.gmra.mxu0 %v3413_v29  ;;  %1388 = vmatmul.bf16.gmra.mxu1 %v3415_v26 }
 0x4da   :  { %v790_v0 = vpop.f32.mrf.mxu0  ;;  %v819_v13 = vpop.f32.mrf.mxu1 }
 0x4db   :  { %v839_v21 = vpack.c.bf16 %v819_v13, %v790_v0  ;;  %v2979_v0 = vld [vmem:[#allocation2 + $0x64] sm:$0xf]  ;;  %v2548_v13 = vld [vmem:[#allocation2 + $0x68] sm:$0xf0] }
 0x4dd   :  { %1460 = vmatmul.bf16.vlgmr.msra.gmra.mxu0 %v3431_v59  ;;  %1489 = vmatmul.bf16.vlgmr.msra.gmra.mxu1 %v3433_v57  ;;  %v855_v46 = vunpack.c.l.b16 %v839_v21  ;;  %v856_v5 = vunpack.c.h.b16 %v839_v21  ;;  %v2588_v57 = vld [vmem:[#allocation2 + $0xb8] sm:$0xf0]  ;;  %v2995_v21 = vld [vmem:[#allocation2 + $0xe4] sm:$0xf] }
 0x4de   :  { %v2591_v58 = vor.u32 %v2989_v55, %v2588_v57 }
 0x4e0   :  { %1394 = vmatpush.bf16.msrb.mxu3 %v2591_v58  ;;  %v2975_v58 = vld [vmem:[#allocation2 + $0x44] sm:$0xf] }
 0x4e2   :  { %v792_v39 = vpop.f32.mrf.mxu0  ;;  %v821_v11 = vpop.f32.mrf.mxu1 }
 0x4e3   :  { %v840_v44 = vpack.c.bf16 %v821_v11, %v792_v39  ;;  %v2612_v39 = vld [vmem:[#allocation2 + $0xe8] sm:$0xf0]  ;;  %v2551_v11 = vor.u32 %v2979_v0, %v2548_v13  ;;  %v3107_v0 = vld [vmem:[#allocation4 + $0x1e0] sm:$0xff] }
 0x4e4   :  { %1395 = vmatpush.bf16.msrb.mxu3 %v2583_v3  ;;  %v3108_v13 = vld [vmem:[#allocation4 + $0xc0] sm:$0xff] }
 0x4e5   :  { %v857_v47 = vunpack.c.l.b16 %v840_v44  ;;  %v858_v50 = vunpack.c.h.b16 %v840_v44  ;;  %v2615_v44 = vor.u32 %v2995_v21, %v2612_v39  ;;  %v3109_v21 = vld [vmem:[#allocation4 + $0x1d0] sm:$0xff] }
 0x4e6   :  { %v3110_v39 = vld [vmem:[#allocation4 + $0xb0] sm:$0xff] }
 0x4e7   :  { %v3463_v51 = vpack.c.b16 %v857_v47, %v855_v46  ;;  %v3465_v52 = vpack.c.b16 %v858_v50, %v856_v5  ;;  %v2977_v50 = vld [vmem:[#allocation2 + $0x54] sm:$0xf]  ;;  %1428 = vmatpush.bf16.msra.mxu2 %v2615_v44  ;;  %v3112_v44 = vld [vmem:[#allocation4 + $0xa0] sm:$0xff] }
 0x4e9   :  { %1286 = vmatmul.bf16.vlgmr.msra.gmra.mxu3 %v3463_v51  ;;  %1315 = vmatmul.bf16.vlgmr.msrb.gmra.mxu2 %v3465_v52 }
 0x4ea   :  { %v795_v54 = vpop.f32.mrf.mxu0  ;;  %v824_v59 = vpop.f32.mrf.mxu1 }
 0x4eb   :  { %v841_v43 = vpack.c.bf16 %v824_v59, %v795_v54  ;;  %v2540_v54 = vld [vmem:[#allocation2 + $0x58] sm:$0xf0]  ;;  %v2993_v59 = vld [vmem:[#allocation2 + $0xd4] sm:$0xf] }
 0x4ec   :  { %v2543_v57 = vor.u32 %v2977_v50, %v2540_v54  ;;  %v3116_v50 = vld [vmem:[#allocation4 + $0x80] sm:$0xff]  ;;  %v3117_v54 = vld [vmem:[#allocation4 + $0x190] sm:$0xff] }
 0x4ed   :  { %1465 = vmatmul.bf16.gmra.mxu0 %v3425_v17  ;;  %1494 = vmatmul.bf16.gmra.mxu1 %v3427_v61  ;;  %v2572_v17 = vld [vmem:[#allocation2 + $0x98] sm:$0xf0]  ;;  %v859_v61 = vunpack.c.l.b16 %v841_v43  ;;  %v860_v31 = vunpack.c.h.b16 %v841_v43 }
 0x4ee   :  { %v2575_v48 = vor.u32 %v2985_v63, %v2572_v17  ;;  %v3091_v63 = vld [vmem:[#allocation4 + $0x150] sm:$0xff]  ;;  %v3092_v17 = vld [vmem:[#allocation4 + $0x140] sm:$0xff] }
 0x4f0   :  { %1396 = vmatpush.bf16.msrb.mxu3 %v2575_v48  ;;  %v3095_v48 = vld [vmem:[#allocation4 + $0x240] sm:$0xff] }
 0x4f2   :  { %v797_v49 = vpop.f32.mrf.mxu0  ;;  %v826_v6 = vpop.f32.mrf.mxu1 }
 0x4f3   :  { %v842_v36 = vpack.c.bf16 %v826_v6, %v797_v49  ;;  %v2599_v49 = vor.u32 %v2991_v9, %v2596_v2 }
 0x4f4   :  { %1397 = vmatpush.bf16.msrb.mxu3 %v2567_v23 }
 0x4f5   :  { %v861_v12 = vunpack.c.l.b16 %v842_v36  ;;  %v862_v14 = vunpack.c.h.b16 %v842_v36 }
 0x4f7   :  { %v3471_v19 = vpack.c.b16 %v861_v12, %v859_v61  ;;  %v3473_v22 = vpack.c.b16 %v862_v14, %v860_v31  ;;  %v3094_v61 = vld [vmem:[#allocation4 + $0x130] sm:$0xff]  ;;  %v3096_v31 = vld [vmem:[#allocation4 + $0x120] sm:$0xff] }
 0x4f8   :  { %1398 = vmatpush.bf16.msrb.mxu3 %v2559_v32  ;;  %v3097_v12 = vld [vmem:[#allocation4 + $0x230] sm:$0xff]  ;;  %v3104_v32 = vld [vmem:[#allocation4 + $0xe0] sm:$0xff] }
 0x4f9   :  { %1291 = vmatmul.bf16.gmra.mxu3 %v3471_v19  ;;  %1320 = vmatmul.bf16.gmra.mxu2 %v3473_v22 }
 0x4fa   :  { %v800_v25 = vpop.f32.mrf.mxu0  ;;  %v829_v27 = vpop.f32.mrf.mxu1 }
 0x4fb   :  { %v843_v46 = vpack.c.bf16 %v829_v27, %v800_v25  ;;  %v3101_v25 = vld [vmem:[#allocation4 + $0x210] sm:$0xff] }
 0x4fc   :  { %1399 = vmatpush.bf16.msrb.mxu3 %v2551_v11  ;;  %v3111_v11 = vld [vmem:[#allocation4 + $0x1c0] sm:$0xff] }
 0x4fd   :  { %1470 = vmatmul.bf16.gmra.mxu0 %v3419_v33  ;;  %1499 = vmatmul.bf16.gmra.mxu1 %v3421_v41  ;;  %v2607_v33 = vor.u32 %v2993_v59, %v2604_v56  ;;  %v2532_v41 = vld [vmem:[#allocation2 + $0x48] sm:$0xf0]  ;;  %v863_v1 = vunpack.c.l.b16 %v843_v46  ;;  %v864_v60 = vunpack.c.h.b16 %v843_v46  ;;  %v3113_v46 = vld [vmem:[#allocation4 + $0x1b0] sm:$0xff] }
 0x4fe   :  { %v2535_v4 = vor.u32 %v2975_v58, %v2532_v41  ;;  %v3118_v59 = vld [vmem:[#allocation4 + $0x70] sm:$0xff] }
 0x4ff   :  { %1429 = vmatpush.bf16.msra.mxu2 %v2607_v33  ;;  %v3121_v56 = vld [vmem:[#allocation4 + $0x170] sm:$0xff]  ;;  %v3122_v33 = vld [vmem:[#allocation4 + $0x160] sm:$0xff] }
 0x500   :  { %1400 = vmatpush.bf16.msrb.mxu3 %v2543_v57  ;;  %v3120_v57 = vld [vmem:[#allocation4 + $0x60] sm:$0xff] }
 0x502   :  { %v802_v5 = vpop.f32.mrf.mxu0  ;;  %v831_v47 = vpop.f32.mrf.mxu1 }
 0x503   :  { %v844_v55 = vpack.c.bf16 %v831_v47, %v802_v5  ;;  %1430 = vmatpush.bf16.msra.mxu2 %v2599_v49  ;;  %v3114_v5 = vld [vmem:[#allocation4 + $0x90] sm:$0xff]  ;;  %v3115_v47 = vld [vmem:[#allocation4 + $0x1a0] sm:$0xff] }
 0x504   :  { %1401 = vmatpush.bf16.msrb.mxu3 %v2535_v4 }
 0x505   :  { %v865_v53 = vunpack.c.l.b16 %v844_v55  ;;  %v866_v62 = vunpack.c.h.b16 %v844_v55  ;;  %v3119_v55 = vld [vmem:[#allocation4 + $0x180] sm:$0xff] }
 0x507   :  { %v3479_v3 = vpack.c.b16 %v865_v53, %v863_v1  ;;  %v3481_v43 = vpack.c.b16 %v866_v62, %v864_v60  ;;  %1600 = vmatpush.msrb.mxu2 %v3093_v7 }
 0x508   :  { %1580 = vmatpush.msra.mxu3 %v3091_v63 }
 0x509   :  { %1296 = vmatmul.bf16.gmra.mxu3 %v3479_v3  ;;  %1325 = vmatmul.bf16.gmra.mxu2 %v3481_v43 }
 0x50a   :  { %v805_v6 = vpop.f32.mrf.mxu0  ;;  %v834_v36 = vpop.f32.mrf.mxu1  ;;  %1581 = vmatpush.msra.mxu3 %v3092_v17  ;;  %1601 = vmatpush.msrb.mxu2 %v3095_v48 }
 0x50b   :  { %v845_v8 = vpack.c.bf16 %v834_v36, %v805_v6  ;;  %v3497_v6 = vld [vmem:[#allocation4 + $0x3] ss:$8 sm:$0x3] }
 0x50c   :  { %1582 = vmatpush.msra.mxu3 %v3094_v61  ;;  %1602 = vmatpush.msrb.mxu2 %v3097_v12  ;;  %v954_v36 = vperm.slane %v3497_v6, 0 }
 0x50d   :  { %1475 = vmatmul.bf16.gmra.mxu0 %v3413_v29  ;;  %1504 = vmatmul.bf16.gmra.mxu1 %v3415_v26  ;;  %v3099_v29 = vld [vmem:[#allocation4 + $0x220] sm:$0xff]  ;;  %v867_v26 = vunpack.c.l.b16 %v845_v8  ;;  %v868_v16 = vunpack.c.h.b16 %v845_v8 }
 0x50e   :  { %1583 = vmatpush.msra.mxu3 %v3096_v31  ;;  %1603 = vmatpush.msrb.mxu2 %v3099_v29 }
 0x510   :  { %1584 = vmatpush.msra.mxu3 %v3098_v15  ;;  %1604 = vmatpush.msrb.mxu2 %v3101_v25 }
 0x512   :  { %v807_v35 = vpop.f32.mrf.mxu0  ;;  %v836_v10 = vpop.f32.mrf.mxu1  ;;  %1585 = vmatpush.msra.mxu3 %v3100_v24  ;;  %1605 = vmatpush.msrb.mxu2 %v3103_v30 }
 0x513   :  { %v846_v14 = vpack.c.bf16 %v836_v10, %v807_v35 }
 0x514   :  { %1586 = vmatpush.msra.mxu3 %v3102_v20  ;;  %1606 = vmatpush.msrb.mxu2 %v3105_v37 }
 0x515   :  { %v869_v18 = vunpack.c.l.b16 %v846_v14  ;;  %v870_v23 = vunpack.c.h.b16 %v846_v14 }
 0x516   :  { %1587 = vmatpush.msra.mxu3 %v3104_v32  ;;  %1607 = vmatpush.msrb.mxu2 %v3107_v0 }
 0x517   :  { %v877_v27 = vpack.c.b16 %v869_v18, %v867_v26  ;;  %v878_v28 = vpack.c.b16 %v870_v23, %v868_v16 }
 0x518   :  { %1588 = vmatpush.msra.mxu3 %v3106_v34  ;;  %1608 = vmatpush.msrb.mxu2 %v3109_v21 }
 0x519   :  { %1301 = vmatmul.bf16.gmra.mxu3 %v877_v27  ;;  %1330 = vmatmul.bf16.gmra.mxu2 %v878_v28 }
 0x51a   :  { %1589 = vmatpush.msra.mxu3 %v3108_v13  ;;  %1609 = vmatpush.msrb.mxu2 %v3111_v11 }
 0x51c   :  { %1590 = vmatpush.msra.mxu3 %v3110_v39  ;;  %1610 = vmatpush.msrb.mxu2 %v3113_v46 }
 0x51e   :  { %1591 = vmatpush.msra.mxu3 %v3112_v44  ;;  %1611 = vmatpush.msrb.mxu2 %v3115_v47 }
 0x520   :  { %1592 = vmatpush.msra.mxu3 %v3114_v5  ;;  %1612 = vmatpush.msrb.mxu2 %v3117_v54 }
 0x522   :  { %1593 = vmatpush.msra.mxu3 %v3116_v50  ;;  %1613 = vmatpush.msrb.mxu2 %v3119_v55 }
 0x524   :  { %1594 = vmatpush.msra.mxu3 %v3118_v59  ;;  %1614 = vmatpush.msrb.mxu2 %v3121_v56 }
 0x526   :  { %1595 = vmatpush.msra.mxu3 %v3120_v57  ;;  %1615 = vmatpush.msrb.mxu2 %v3122_v33 }
 0x529   :  { %1402 = vmatmul.bf16.vlgmr.msrb.gmra.mxu3 %v3463_v51  ;;  %1431 = vmatmul.bf16.vlgmr.msra.gmra.mxu2 %v3465_v52  ;;  %v1345_v51 = vpop.f32.mrf.mxu0  ;;  %v1374_v52 = vpop.f32.mrf.mxu1 }
 0x52a   :  { %1665 = vmatpush.msrb.mxu3 %v3382_v38 }
 0x52c   :  { %1666 = vmatpush.msrb.mxu3 %v3385_v40 }
 0x52e   :  { %1667 = vmatpush.msrb.mxu3 %v3388_v42 }
 0x530   :  { %1668 = vmatpush.msrb.mxu3 %v3391_v45 }
 0x531   :  { %v1347_v38 = vpop.f32.mrf.mxu0  ;;  %v1376_v58 = vpop.f32.mrf.mxu1 }
 0x539   :  { %1407 = vmatmul.bf16.gmra.mxu3 %v3471_v19  ;;  %1436 = vmatmul.bf16.gmra.mxu2 %v3473_v22  ;;  %v1350_v41 = vpop.f32.mrf.mxu0  ;;  %v1379_v40 = vpop.f32.mrf.mxu1 }
 0x541   :  { %v1352_v60 = vpop.f32.mrf.mxu0  ;;  %v1381_v45 = vpop.f32.mrf.mxu1 }
 0x549   :  { %1412 = vmatmul.bf16.gmra.mxu3 %v3479_v3  ;;  %1441 = vmatmul.bf16.gmra.mxu2 %v3481_v43  ;;  %v1355_v62 = vpop.f32.mrf.mxu0  ;;  %v1384_v22 = vpop.f32.mrf.mxu1 }
 0x551   :  { %v1357_v3 = vpop.f32.mrf.mxu0  ;;  %v1386_v49 = vpop.f32.mrf.mxu1 }
 0x559   :  { %1417 = vmatmul.bf16.gmra.mxu3 %v877_v27  ;;  %1446 = vmatmul.bf16.gmra.mxu2 %v878_v28  ;;  %v1360_v7 = vpop.f32.mrf.mxu0  ;;  %v1389_v48 = vpop.f32.mrf.mxu1 }
 0x561   :  { %v1362_v18 = vpop.f32.mrf.mxu0  ;;  %v1391_v28 = vpop.f32.mrf.mxu1 }
 0x569   :  { %v3514_v59 = vpop.f32.mrf.mxu0 }
 0x56c   :  { %v1287_v1 = vpop.f32.mrf.mxu3  ;;  %v1316_v42 = vpop.f32.mrf.mxu2 }
 0x56d   :  { %v1288_v8 = vadd.f32 %v1287_v1, %v954_v36 }
 0x56f   :  { %v1317_v12 = vadd.f32 %v1316_v42, %v1288_v8 }
 0x571   :  { %v1346_v25 = vadd.f32 %v1345_v51, %v1317_v12  ;;  %v3520_v51 = vpop.f32.mrf.mxu1 }
 0x573   :  { %v3502_v34 = vadd.f32 %v1374_v52, %v1346_v25 }
 0x574   :  { %v1289_v53 = vpop.f32.mrf.mxu3  ;;  %v1318_v19 = vpop.f32.mrf.mxu2 }
 0x575   :  { %v1290_v61 = vadd.f32 %v1289_v53, %v954_v36  ;;  %v1536_v50 = vmul.f32 %v3502_v34, %v3502_v34 }
 0x577   :  { %v1319_v10 = vadd.f32 %v1318_v19, %v1290_v61 }
 0x579   :  { %v1348_v16 = vadd.f32 %v1347_v38, %v1319_v10 }
 0x57b   :  { %v3500_v30 = vadd.f32 %v1376_v58, %v1348_v16 }
 0x57c   :  { %v1292_v9 = vpop.f32.mrf.mxu3  ;;  %v1321_v2 = vpop.f32.mrf.mxu2 }
 0x57d   :  { %v1293_v35 = vadd.f32 %v1292_v9, %v954_v36  ;;  %v1538_v44 = vmul.f32 %v3500_v30, %v3500_v30  ;;  %v1510_v55 = vadd.f32 %v3500_v30, %v3502_v34 }
 0x57f   :  { %v1322_v14 = vadd.f32 %v1321_v2, %v1293_v35  ;;  %v1552_v33 = vadd.f32 %v1538_v44, %v1536_v50  ;;  %v3124_v50 = vld [vmem:[#allocation4 + $0x48] sm:$0xff] }
 0x581   :  { %v1351_v27 = vadd.f32 %v1350_v41, %v1322_v14 }
 0x583   :  { %v3504_v0 = vadd.f32 %v1379_v40, %v1351_v27 }
 0x584   :  { %v1294_v43 = vpop.f32.mrf.mxu3  ;;  %v1323_v4 = vpop.f32.mrf.mxu2 }
 0x585   :  { %v1295_v31 = vadd.f32 %v1294_v43, %v954_v36  ;;  %v1540_v54 = vmul.f32 %v3504_v0, %v3504_v0  ;;  %v1511_v52 = vadd.f32 %v1510_v55, %v3504_v0 }
 0x587   :  { %v1324_v23 = vadd.f32 %v1323_v4, %v1295_v31  ;;  %v1553_v41 = vadd.f32 %v1552_v33, %v1540_v54  ;;  %v3125_v54 = vld [vmem:[#allocation4 + $0x38] sm:$0xff]  ;;  %v3126_v33 = vld [vmem:[#allocation4 + $0x28] sm:$0xff] }
 0x589   :  { %v1353_v32 = vadd.f32 %v1352_v60, %v1324_v23 }
 0x58b   :  { %v3508_v46 = vadd.f32 %v1381_v45, %v1353_v32 }
 0x58c   :  { %v1297_v63 = vpop.f32.mrf.mxu3  ;;  %v1326_v17 = vpop.f32.mrf.mxu2 }
 0x58d   :  { %v1298_v26 = vadd.f32 %v1297_v63, %v954_v36  ;;  %v1542_v38 = vmul.f32 %v3508_v46, %v3508_v46  ;;  %v1512_v42 = vadd.f32 %v1511_v52, %v3508_v46 }
 0x58f   :  { %v1327_v20 = vadd.f32 %v1326_v17, %v1298_v26  ;;  %v1554_v19 = vadd.f32 %v1553_v41, %v1542_v38  ;;  %v955_v41 = vperm.slane %v3497_v6, 1 }
 0x591   :  { %v1356_v39 = vadd.f32 %v1355_v62, %v1327_v20 }
 0x593   :  { %v3518_v57 = vadd.f32 %v1384_v22, %v1356_v39 }
 0x594   :  { %v1299_v15 = vpop.f32.mrf.mxu3  ;;  %v1328_v29 = vpop.f32.mrf.mxu2 }
 0x595   :  { %v1300_v24 = vadd.f32 %v1299_v15, %v954_v36  ;;  %v1544_v60 = vmul.f32 %v3518_v57, %v3518_v57  ;;  %v1513_v62 = vadd.f32 %v1512_v42, %v3518_v57 }
 0x597   :  { %v1329_v37 = vadd.f32 %v1328_v29, %v1300_v24  ;;  %v1555_v2 = vadd.f32 %v1554_v19, %v1544_v60 }
 0x599   :  { %v1358_v5 = vadd.f32 %v1357_v3, %v1329_v37 }
 0x59b   :  { %v3525_v58 = vadd.f32 %v1386_v49, %v1358_v5  ;;  %v1463_v49 = vpop.f32.mrf.mxu0  ;;  %v3123_v5 = vld [vmem:[#allocation4 + $0x58] sm:$0xff] }
 0x59c   :  { %v1302_v13 = vpop.f32.mrf.mxu3  ;;  %v1331_v21 = vpop.f32.mrf.mxu2 }
 0x59d   :  { %v1303_v11 = vadd.f32 %v1302_v13, %v954_v36  ;;  %v1546_v22 = vmul.f32 %v3525_v58, %v3525_v58  ;;  %v1514_v3 = vadd.f32 %v1513_v62, %v3525_v58 }
 0x59f   :  { %v1332_v47 = vadd.f32 %v1331_v21, %v1303_v11  ;;  %v1556_v63 = vadd.f32 %v1555_v2, %v1546_v22 }
 0x5a1   :  { %v1361_v56 = vadd.f32 %v1360_v7, %v1332_v47 }
 0x5a3   :  { %v3530_v45 = vadd.f32 %v1389_v48, %v1361_v56  ;;  %v1492_v48 = vpop.f32.mrf.mxu1  ;;  %v1466_v23 = vpop.f32.mrf.mxu0 }
 0x5a4   :  { %v1304_v40 = vpop.f32.mrf.mxu3  ;;  %v1333_v1 = vpop.f32.mrf.mxu2 }
 0x5a5   :  { %v1305_v53 = vadd.f32 %v1304_v40, %v954_v36  ;;  %v1548_v43 = vmul.f32 %v3530_v45, %v3530_v45  ;;  %v1515_v17 = vadd.f32 %v1514_v3, %v3530_v45 }
 0x5a7   :  { %v1334_v9 = vadd.f32 %v1333_v1, %v1305_v53  ;;  %v1557_v8 = vadd.f32 %v1556_v63, %v1548_v43 }
 0x5a9   :  { %v1363_v4 = vadd.f32 %v1362_v18, %v1334_v9 }
 0x5ab   :  { %v3539_v7 = vadd.f32 %v1391_v28, %v1363_v4  ;;  %v1495_v27 = vpop.f32.mrf.mxu1  ;;  %v1468_v44 = vpop.f32.mrf.mxu0 }
 0x5ac   :  { %v1403_v36 = vpop.f32.mrf.mxu3  ;;  %v1432_v61 = vpop.f32.mrf.mxu2 }
 0x5ad   :  { %v1516_v35 = vadd.f32 %v1515_v17, %v3539_v7  ;;  %v1550_v10 = vmul.f32 %v3539_v7, %v3539_v7  ;;  %v1404_v60 = vadd.f32 %v1403_v36, %v955_v41 }
 0x5af   :  { %v1517_v31 = vrot.slane %v1516_v35, 4  ;;  %v1558_v12 = vadd.f32 %v1557_v8, %v1550_v10  ;;  %v1433_v9 = vadd.f32 %v1432_v61, %v1404_v60 }
 0x5b1   :  { %v1518_v14 = vadd.f32 %v1517_v31, %v1516_v35  ;;  %v1559_v15 = vrot.slane %v1558_v12, 4  ;;  %v1462_v10 = vadd.f32 %v3514_v59, %v1433_v9 }
 0x5b3   :  { %v1519_v29 = vrot.slane %v1518_v14, 2  ;;  %v1560_v26 = vadd.f32 %v1559_v15, %v1558_v12  ;;  %v1497_v47 = vpop.f32.mrf.mxu1  ;;  %v1471_v52 = vpop.f32.mrf.mxu0  ;;  %v3550_v15 = vadd.f32 %v3520_v51, %v1462_v10 }
 0x5b4   :  { %v1405_v16 = vpop.f32.mrf.mxu3  ;;  %v1434_v18 = vpop.f32.mrf.mxu2 }
 0x5b5   :  { %v1520_v24 = vadd.f32 %v1519_v29, %v1518_v14  ;;  %v1561_v25 = vrot.slane %v1560_v26, 2  ;;  %v1406_v42 = vadd.f32 %v1405_v16, %v955_v41 }
 0x5b7   :  { %v1521_v28 = vrot.slane %v1520_v24, 1  ;;  %v1562_v20 = vadd.f32 %v1561_v25, %v1560_v26  ;;  %v1435_v19 = vadd.f32 %v1434_v18, %v1406_v42 }
 0x5b9   :  { %v1563_v32 = vrot.slane %v1562_v20, 1  ;;  %v1522_v37 = vadd.f32 %v1521_v28, %v1520_v24  ;;  %v1464_v17 = vadd.f32 %v1463_v49, %v1435_v19  ;;  %v1537_v28 = vmul.f32 %v3550_v15, %v3550_v15 }
 0x5bb   :  { %v1564_v13 = vadd.f32 %v1563_v32, %v1562_v20  ;;  %v1500_v38 = vpop.f32.mrf.mxu1  ;;  %v1473_v62 = vpop.f32.mrf.mxu0  ;;  %v3547_v12 = vadd.f32 %v1492_v48, %v1464_v17 }
 0x5bc   :  { %v1408_v21 = vpop.f32.mrf.mxu3  ;;  %v1437_v39 = vpop.f32.mrf.mxu2 }
 0x5bd   :  { %v1578_v11 = vsel %vm564_vm6, %v1522_v37, %v1564_v13  ;;  %v1409_v53 = vadd.f32 %v1408_v21, %v955_v41  ;;  %v1539_v24 = vmul.f32 %v3547_v12, %v3547_v12 }
 0x5be   :  { %1596 = vmatmul.f32.vlgmr.msra.gmra.mxu3 %v1578_v11 }
 0x5bf   :  { %1685 = vmatpush.msra.mxu3 %v3123_v5  ;;  %v1438_v2 = vadd.f32 %v1437_v39, %v1409_v53  ;;  %v1565_v37 = vadd.f32 %v1539_v24, %v1537_v28 }
 0x5c1   :  { %1686 = vmatpush.msra.mxu3 %v3124_v50  ;;  %v1467_v6 = vadd.f32 %v1466_v23, %v1438_v2 }
 0x5c3   :  { %1687 = vmatpush.msra.mxu3 %v3125_v54  ;;  %v1502_v63 = vpop.f32.mrf.mxu1  ;;  %v3552_v61 = vadd.f32 %v1495_v27, %v1467_v6  ;;  %v1476_v49 = vpop.f32.mrf.mxu0  ;;  %v1523_v27 = vadd.f32 %v3547_v12, %v3550_v15 }
 0x5c4   :  { %v1410_v55 = vpop.f32.mrf.mxu3  ;;  %v1439_v56 = vpop.f32.mrf.mxu2 }
 0x5c5   :  { %1688 = vmatpush.msra.mxu3 %v3126_v33  ;;  %v1411_v22 = vadd.f32 %v1410_v55, %v955_v41  ;;  %v1541_v51 = vmul.f32 %v3552_v61, %v3552_v61  ;;  %v1524_v13 = vadd.f32 %v1523_v27, %v3552_v61 }
 0x5c7   :  { %v1440_v8 = vadd.f32 %v1439_v56, %v1411_v22  ;;  %v1566_v11 = vadd.f32 %v1565_v37, %v1541_v51 }
 0x5c9   :  { %v1469_v36 = vadd.f32 %v1468_v44, %v1440_v8 }
 0x5cb   :  { %v3556_v59 = vadd.f32 %v1497_v47, %v1469_v36  ;;  %v1505_v25 = vpop.f32.mrf.mxu1 }
 0x5cc   :  { %v1413_v40 = vpop.f32.mrf.mxu3  ;;  %v1442_v1 = vpop.f32.mrf.mxu2 }
 0x5cd   :  { %v1414_v4 = vadd.f32 %v1413_v40, %v955_v41  ;;  %v1543_v21 = vmul.f32 %v3556_v59, %v3556_v59  ;;  %v1525_v5 = vadd.f32 %v1524_v13, %v3556_v59  ;;  %v1478_v40 = vpop.f32.mrf.mxu0 }
 0x5cf   :  { %v1443_v31 = vadd.f32 %v1442_v1, %v1414_v4  ;;  %v1567_v56 = vadd.f32 %v1566_v11, %v1543_v21 }
 0x5d1   :  { %v1472_v16 = vadd.f32 %v1471_v52, %v1443_v31 }
 0x5d3   :  { %v3564_v20 = vadd.f32 %v1500_v38, %v1472_v16  ;;  %v1507_v19 = vpop.f32.mrf.mxu1 }
 0x5d4   :  { %v1415_v3 = vpop.f32.mrf.mxu3  ;;  %v1444_v43 = vpop.f32.mrf.mxu2 }
 0x5d5   :  { %v1416_v35 = vadd.f32 %v1415_v3, %v955_v41  ;;  %v1545_v47 = vmul.f32 %v3564_v20, %v3564_v20  ;;  %v1526_v33 = vadd.f32 %v1525_v5, %v3564_v20 }
 0x5d7   :  { %v1445_v14 = vadd.f32 %v1444_v43, %v1416_v35  ;;  %v1568_v1 = vadd.f32 %v1567_v56, %v1545_v47  ;;  %v1640_v56 = vld [vmem:[#allocation4 + $0x12] ss:$0 sm:$0xff] }
 0x5d9   :  { %v1474_v23 = vadd.f32 %v1473_v62, %v1445_v14 }
 0x5db   :  { %v3569_v39 = vadd.f32 %v1502_v63, %v1474_v23 }
 0x5dc   :  { %v1418_v29 = vpop.f32.mrf.mxu3  ;;  %v1447_v26 = vpop.f32.mrf.mxu2 }
 0x5dd   :  { %v1419_v18 = vadd.f32 %v1418_v29, %v955_v41  ;;  %v1547_v52 = vmul.f32 %v3569_v39, %v3569_v39  ;;  %v1527_v42 = vadd.f32 %v1526_v33, %v3569_v39 }
 0x5df   :  { %v1448_v48 = vadd.f32 %v1447_v26, %v1419_v18  ;;  %v1569_v62 = vadd.f32 %v1568_v1, %v1547_v52 }
 0x5e1   :  { %v1477_v32 = vadd.f32 %v1476_v49, %v1448_v48 }
 0x5e3   :  { %v3574_v50 = vadd.f32 %v1505_v25, %v1477_v32 }
 0x5e4   :  { %v1420_v44 = vpop.f32.mrf.mxu3  ;;  %v1449_v55 = vpop.f32.mrf.mxu2 }
 0x5e5   :  { %v1421_v54 = vadd.f32 %v1420_v44, %v955_v41  ;;  %v1549_v60 = vmul.f32 %v3574_v50, %v3574_v50  ;;  %v1528_v41 = vadd.f32 %v1527_v42, %v3574_v50  ;;  %v1627_v44 = vld [vmem:[#allocation4 + $0x11] ss:$0 sm:$0xff] }
 0x5e7   :  { %v1450_v38 = vadd.f32 %v1449_v55, %v1421_v54  ;;  %v1570_v9 = vadd.f32 %v1569_v62, %v1549_v60 }
 0x5e9   :  { %v1479_v53 = vadd.f32 %v1478_v40, %v1450_v38 }
 0x5eb   :  { %v3583_v22 = vadd.f32 %v1507_v19, %v1479_v53 }
 0x5ed   :  { %v1529_v2 = vadd.f32 %v1528_v41, %v3583_v22  ;;  %v1551_v3 = vmul.f32 %v3583_v22, %v3583_v22 }
 0x5ef   :  { %v1530_v43 = vrot.slane %v1529_v2, 4  ;;  %v1571_v4 = vadd.f32 %v1570_v9, %v1551_v3 }
 0x5f1   :  { %v1531_v63 = vadd.f32 %v1530_v43, %v1529_v2  ;;  %v1572_v17 = vrot.slane %v1571_v4, 4 }
 0x5f3   :  { %v1532_v8 = vrot.slane %v1531_v63, 2  ;;  %v1573_v35 = vadd.f32 %v1572_v17, %v1571_v4 }
 0x5f5   :  { %v1533_v10 = vadd.f32 %v1532_v8, %v1531_v63  ;;  %v1574_v6 = vrot.slane %v1573_v35, 2 }
 0x5f7   :  { %v1534_v31 = vrot.slane %v1533_v10, 1  ;;  %v1575_v36 = vadd.f32 %v1574_v6, %v1573_v35 }
 0x5f9   :  { %v1576_v14 = vrot.slane %v1575_v36, 1  ;;  %v1535_v29 = vadd.f32 %v1534_v31, %v1533_v10 }
 0x5fb   :  { %v1577_v26 = vadd.f32 %v1576_v14, %v1575_v36 }
 0x5fd   :  { %v1579_v16 = vsel %vm564_vm6, %v1535_v29, %v1577_v26 }
 0x5fe   :  { %1616 = vmatmul.f32.vlgmr.msrb.gmra.mxu2 %v1579_v16 }
 0x641   :  { %v1597_v18 = vpop.f32.mrf.mxu3 }
 0x681   :  { %v1617_v49 = vpop.f32.mrf.mxu2 }
 0x682   :  { %v1618_v24 = vadd.f32 %v1617_v49, %v1597_v18 }
 0x684   :  { %v1620_v23 = vmul.f32 0.001953125, %v1618_v24 }
 0x686   :  { %v1621_v48 = vmul.f32 %v1620_v23, %v1620_v23 }
 0x688   :  { %v1623_v25 = vrot.slane %v1621_v48, 7 }
 0x68a   :  { %v1625_v28 = vsub.f32 %v1620_v23, %v1623_v25 }
 0x68c   :  { %v1626_v51 = vmax.f32 %v1625_v28, 0.0 }
 0x68e   :  { %v1628_v27 = vadd.f32 1e-05, %v1626_v51 }
 0x690   :  { %3089 = vrsqrt.f32 %v1628_v27  ;;  %vm1635_vm12 = vweird.f32 %v1628_v27 }
 0x696   :  { %v3090_v32 = vpop.eup %3089 }
 0x697   :  { %v1630_v37 = vmul.f32 %v3090_v32, %v1628_v27  ;;  %vm1636_vm11 = vweird.f32 %v3090_v32 }
 0x698   :  { %vm1637_vm13 = vmor %vm1635_vm12, %vm1636_vm11 }
 0x699   :  { %v1631_v13 = vmul.f32 %v3090_v32, %v1630_v37 }
 0x69b   :  { %v1632_v21 = vmul.f32 0.5, %v1631_v13 }
 0x69d   :  { %v1633_v11 = vsub.f32 1.5, %v1632_v21 }
 0x69f   :  { %v1634_v5 = vmul.f32 %v3090_v32, %v1633_v11 }
 0x6a1   :  { %v1638_v47 = vsel %vm1637_vm13, %v3090_v32, %v1634_v5 }
 0x6a2   :  { %v1639_v54 = vmul.f32 %v1638_v47, %v1627_v44 }
 0x6a4   :  { %v1642_v55 = vrot.slane %v1639_v54, 1 }
 0x6a6   :  { %v1644_v33 = vmul.f32 %v1642_v55, %v1620_v23 }
 0x6a8   :  { %v1645_v52 = vsub.f32 %v1640_v56, %v1644_v33 }
 0x6aa   :  { %v1647_v38 = vrot.slane %v1645_v52, 7 }
 0x6ac   :  { %v1649_v40 = vsel %vm564_vm6, %v1642_v55, %v1647_v38 }
 0x6ad   :  { %2784 = vmatmul.msk.f32.vlgmr.msrb.gmra.mxu3 %vm637_vm10, %v1649_v40 }
 0x6b5   :  { %2785 = vmatmul.msk.f32.vlgmr.msra.gmra.mxu3 %vm637_vm10, %v1649_v40 }
 0x730   :  { %v1670_v1 = vpop.f32.mrf.mxu3 }
 0x731   :  { %v1693_v42 = vperm.slane %v1670_v1, 0  ;;  %v1711_v60 = vperm.slane %v1670_v1, 1 }
 0x733   :  { %v1707_v53 = vmul.f32 %v1693_v42, %v3530_v45  ;;  %v1709_v19 = vmul.f32 %v1693_v42, %v3539_v7  ;;  %v1703_v62 = vmul.f32 %v1693_v42, %v3518_v57  ;;  %v1705_v41 = vmul.f32 %v1693_v42, %v3525_v58 }
 0x734   :  { %v1699_v2 = vmul.f32 %v1693_v42, %v3504_v0  ;;  %v1701_v3 = vmul.f32 %v1693_v42, %v3508_v46  ;;  %v1695_v8 = vmul.f32 %v1693_v42, %v3502_v34  ;;  %v1697_v35 = vmul.f32 %v1693_v42, %v3500_v30 }
 0x735   :  { %v1725_v9 = vadd.f32 %v1711_v60, %v1707_v53  ;;  %v1727_v43 = vadd.f32 %v1711_v60, %v1709_v19  ;;  %v1721_v4 = vadd.f32 %v1711_v60, %v1703_v62  ;;  %v1723_v63 = vadd.f32 %v1711_v60, %v1705_v41 }
 0x736   :  { %v1717_v7 = vadd.f32 %v1711_v60, %v1699_v2  ;;  %v1719_v6 = vadd.f32 %v1711_v60, %v1701_v3  ;;  %v1713_v32 = vadd.f32 %v1711_v60, %v1695_v8 }
 0x737   :  { %v1741_v10 = vmax.f32 %v1725_v9, 0.0  ;;  %v1743_v31 = vmax.f32 %v1727_v43, 0.0  ;;  %v1737_v58 = vmax.f32 %v1721_v4, 0.0  ;;  %v1739_v36 = vmax.f32 %v1723_v63, 0.0 }
 0x738   :  { %v1690_v17 = vpop.f32.mrf.mxu3  ;;  %v1733_v21 = vmax.f32 %v1717_v7, 0.0  ;;  %v1735_v11 = vmax.f32 %v1719_v6, 0.0  ;;  %v1729_v19 = vmax.f32 %v1713_v32, 0.0 }
 0x739   :  { %v1694_v45 = vperm.slane %v1690_v17, 0  ;;  %v1712_v57 = vperm.slane %v1690_v17, 1 }
 0x73b   :  { %v1708_v0 = vmul.f32 %v1694_v45, %v3574_v50  ;;  %v1710_v46 = vmul.f32 %v1694_v45, %v3583_v22  ;;  %v1704_v14 = vmul.f32 %v1694_v45, %v3564_v20  ;;  %v1706_v29 = vmul.f32 %v1694_v45, %v3569_v39 }
 0x73c   :  { %v1700_v34 = vmul.f32 %v1694_v45, %v3552_v61  ;;  %v1702_v30 = vmul.f32 %v1694_v45, %v3556_v59  ;;  %v1696_v26 = vmul.f32 %v1694_v45, %v3550_v15  ;;  %v1698_v16 = vmul.f32 %v1694_v45, %v3547_v12 }
 0x73d   :  { %v1726_v18 = vadd.f32 %v1712_v57, %v1708_v0  ;;  %v1728_v49 = vadd.f32 %v1712_v57, %v1710_v46  ;;  %v1722_v24 = vadd.f32 %v1712_v57, %v1704_v14  ;;  %v1724_v23 = vadd.f32 %v1712_v57, %v1706_v29  ;;  %v3062_v0 = vld [vmem:[#allocation2 + $0x3b4] sm:$0xf0]  ;;  %v2920_v46 = vld [vmem:[#allocation2 + $0x430] sm:$0xf] }
 0x73e   :  { %v1718_v48 = vadd.f32 %v1712_v57, %v1700_v34  ;;  %v1720_v50 = vadd.f32 %v1712_v57, %v1702_v30  ;;  %v1714_v25 = vadd.f32 %v1712_v57, %v1696_v26  ;;  %v1716_v22 = vadd.f32 %v1712_v57, %v1698_v16  ;;  %v3070_v29 = vld [vmem:[#allocation2 + $0x434] sm:$0xf0]  ;;  %v2884_v34 = vld [vmem:[#allocation2 + $0x3a0] sm:$0xf]  ;;  %v3061_v30 = vld [vmem:[#allocation2 + $0x3a4] sm:$0xf0] }
 0x73f   :  { %v1742_v28 = vmax.f32 %v1726_v18, 0.0  ;;  %v1744_v20 = vmax.f32 %v1728_v49, 0.0  ;;  %v1738_v51 = vmax.f32 %v1722_v24, 0.0  ;;  %v1740_v39 = vmax.f32 %v1724_v23, 0.0  ;;  %v2916_v16 = vld [vmem:[#allocation2 + $0x420] sm:$0xf] }
 0x740   :  { %v1734_v27 = vmax.f32 %v1718_v48, 0.0  ;;  %v1736_v61 = vmax.f32 %v1720_v50, 0.0  ;;  %v1715_v59 = vadd.f32 %v1711_v60, %v1697_v35  ;;  %v1730_v44 = vmax.f32 %v1714_v25, 0.0  ;;  %v3069_v18 = vld [vmem:[#allocation2 + $0x424] sm:$0xf0] }
 0x741   :  { %v1751_v37 = vpack.c.bf16 %v1742_v28, %v1741_v10  ;;  %v1752_v15 = vpack.c.bf16 %v1744_v20, %v1743_v31  ;;  %v1749_v13 = vpack.c.bf16 %v1738_v51, %v1737_v58  ;;  %v1750_v12 = vpack.c.bf16 %v1740_v39, %v1739_v36  ;;  %v3127_v58 = vld [vmem:[%s3699_s1] sm:$0xff]  ;;  %v2888_v36 = vld [vmem:[#allocation2 + $0x3b0] sm:$0xf]  ;;  %v3060_v48 = vld [vmem:[#allocation2 + $0x394] sm:$0xf0] }
 0x742   :  { %v1732_v5 = vmax.f32 %v1716_v22, 0.0  ;;  %v1747_v38 = vpack.c.bf16 %v1734_v27, %v1733_v21  ;;  %v1748_v40 = vpack.c.bf16 %v1736_v61, %v1735_v11  ;;  %v1731_v62 = vmax.f32 %v1715_v59, 0.0  ;;  %v2880_v23 = vld [vmem:[#allocation2 + $0x390] sm:$0xf]  ;;  %v3068_v25 = vld [vmem:[#allocation2 + $0x414] sm:$0xf0] }
 0x743   :  { %v1773_v47 = vunpack.c.l.b16 %v1751_v37  ;;  %v1775_v54 = vunpack.c.l.b16 %v1752_v15  ;;  %v1774_v55 = vunpack.c.h.b16 %v1751_v37  ;;  %v1776_v56 = vunpack.c.h.b16 %v1752_v15  ;;  %v2912_v50 = vld [vmem:[#allocation2 + $0x410] sm:$0xf]  ;;  %v2876_v20 = vld [vmem:[#allocation2 + $0x380] sm:$0xf]  ;;  %v3059_v51 = vld [vmem:[#allocation2 + $0x384] sm:$0xf0] }
 0x744   :  { %v1769_v33 = vunpack.c.l.b16 %v1749_v13  ;;  %v1771_v52 = vunpack.c.l.b16 %v1750_v12  ;;  %v1770_v60 = vunpack.c.h.b16 %v1749_v13  ;;  %v1772_v53 = vunpack.c.h.b16 %v1750_v12  ;;  %v2908_v39 = vld [vmem:[#allocation2 + $0x400] sm:$0xf]  ;;  %v3067_v27 = vld [vmem:[#allocation2 + $0x404] sm:$0xf0]  ;;  %v2872_v37 = vld [vmem:[#allocation2 + $0x370] sm:$0xf] }
 0x745   :  { %v3608_v1 = vpack.c.b16 %v1775_v54, %v1773_v47  ;;  %v3610_v42 = vpack.c.b16 %v1776_v56, %v1774_v55  ;;  %v1765_v41 = vunpack.c.l.b16 %v1747_v38  ;;  %v1767_v9 = vunpack.c.l.b16 %v1748_v40  ;;  %v3128_v59 = vld [vmem:[%s3699_s1 + $0x8] sm:$0xff]  ;;  %v3058_v15 = vld [vmem:[#allocation2 + $0x374] sm:$0xf0]  ;;  %v2904_v13 = vld [vmem:[#allocation2 + $0x3f0] sm:$0xf] }
 0x746   :  { %v1745_v2 = vpack.c.bf16 %v1730_v44, %v1729_v19  ;;  %v1746_v3 = vpack.c.bf16 %v1732_v5, %v1731_v62  ;;  %v3614_v43 = vpack.c.b16 %v1771_v52, %v1769_v33  ;;  %v3616_v4 = vpack.c.b16 %v1772_v53, %v1770_v60  ;;  %v3066_v21 = vld [vmem:[#allocation2 + $0x3f4] sm:$0xf0]  ;;  %v2868_v11 = vld [vmem:[#allocation2 + $0x360] sm:$0xf]  ;;  %v3057_v44 = vld [vmem:[#allocation2 + $0x364] sm:$0xf0] }
 0x747   :  { %1797 = vmatpush.bf16.msrb.mxu3 %v3608_v1  ;;  %1826 = vmatpush.bf16.msra.mxu2 %v3610_v42  ;;  %v1766_v63 = vunpack.c.h.b16 %v1747_v38  ;;  %v1768_v17 = vunpack.c.h.b16 %v1748_v40  ;;  %v3620_v8 = vpack.c.b16 %v1767_v9, %v1765_v41  ;;  %v2889_v14 = vor.u32 %v3062_v0, %v2888_v36  ;;  %v2900_v47 = vld [vmem:[#allocation2 + $0x3e0] sm:$0xf]  ;;  %v3065_v54 = vld [vmem:[#allocation2 + $0x3e4] sm:$0xf0]  ;;  %v2864_v56 = vld [vmem:[#allocation2 + $0x350] sm:$0xf] }
 0x748   :  { %v1761_v35 = vunpack.c.l.b16 %v1745_v2  ;;  %v1763_v10 = vunpack.c.l.b16 %v1746_v3  ;;  %v1762_v7 = vunpack.c.h.b16 %v1745_v2  ;;  %v1764_v6 = vunpack.c.h.b16 %v1746_v3  ;;  %v3056_v33 = vld [vmem:[#allocation2 + $0x354] sm:$0xf0]  ;;  %v2896_v38 = vld [vmem:[#allocation2 + $0x3d0] sm:$0xf]  ;;  %v2860_v53 = vld [vmem:[#allocation2 + $0x340] sm:$0xf] }
 0x749   :  { %v3622_v45 = vpack.c.b16 %v1768_v17, %v1766_v63  ;;  %v2921_v26 = vor.u32 %v3070_v29, %v2920_v46  ;;  %v2885_v49 = vor.u32 %v3061_v30, %v2884_v34  ;;  %v2917_v24 = vor.u32 %v3069_v18, %v2916_v16  ;;  %v3064_v40 = vld [vmem:[#allocation2 + $0x3d4] sm:$0xf0]  ;;  %v3055_v19 = vld [vmem:[#allocation2 + $0x344] sm:$0xf0]  ;;  %v2892_v41 = vld [vmem:[#allocation2 + $0x3c0] sm:$0xf] }
 0x74a   :  { %v3626_v57 = vpack.c.b16 %v1763_v10, %v1761_v35  ;;  %v3628_v31 = vpack.c.b16 %v1764_v6, %v1762_v7  ;;  %v2881_v22 = vor.u32 %v3060_v48, %v2880_v23  ;;  %v2913_v28 = vor.u32 %v3068_v25, %v2912_v50  ;;  %v3063_v9 = vld [vmem:[#allocation2 + $0x3c4] sm:$0xf0]  ;;  %v3129_v63 = vld [vmem:[%s3699_s1 + $0x10] sm:$0xff]  ;;  %v3130_v17 = vld [vmem:[%s3699_s1 + $0x18] sm:$0xff] }
 0x74b   :  { %1798 = vmatpush.bf16.msrb.mxu3 %v3614_v43  ;;  %1827 = vmatpush.bf16.msra.mxu2 %v3616_v4  ;;  %v2877_v61 = vor.u32 %v3059_v51, %v2876_v20  ;;  %v2909_v32 = vor.u32 %v3067_v27, %v2908_v39  ;;  %v2873_v12 = vor.u32 %v3058_v15, %v2872_v37  ;;  %v2824_v35 = vld [vmem:[#allocation2 + $0x2b0] sm:$0xf]  ;;  %v3046_v10 = vld [vmem:[#allocation2 + $0x2b4] sm:$0xf0]  ;;  %v2820_v36 = vld [vmem:[#allocation2 + $0x2a0] sm:$0xf] }
 0x74c   :  { %v2905_v5 = vor.u32 %v3066_v21, %v2904_v13  ;;  %v2869_v55 = vor.u32 %v3057_v44, %v2868_v11  ;;  %v2901_v52 = vor.u32 %v3065_v54, %v2900_v47  ;;  %v2865_v60 = vor.u32 %v3056_v33, %v2864_v56  ;;  %v2856_v7 = vld [vmem:[#allocation2 + $0x330] sm:$0xf]  ;;  %v3045_v0 = vld [vmem:[#allocation2 + $0x2a4] sm:$0xf0]  ;;  %v2812_v18 = vld [vmem:[#allocation2 + $0x280] sm:$0xf] }
 0x74d   :  { %v2897_v62 = vor.u32 %v3064_v40, %v2896_v38  ;;  %v2861_v2 = vor.u32 %v3055_v19, %v2860_v53  ;;  %v2893_v3 = vor.u32 %v3063_v9, %v2892_v41  ;;  %v2825_v6 = vor.u32 %v3046_v10, %v2824_v35  ;;  %v3053_v29 = vld [vmem:[#allocation2 + $0x324] sm:$0xf0]  ;;  %v2816_v30 = vld [vmem:[#allocation2 + $0x290] sm:$0xf]  ;;  %v3050_v51 = vld [vmem:[#allocation2 + $0x2f4] sm:$0xf0] }
 0x74e   :  { %v2821_v34 = vor.u32 %v3045_v0, %v2820_v36  ;;  %v3051_v23 = vld [vmem:[#allocation2 + $0x304] sm:$0xf0]  ;;  %v2808_v25 = vld [vmem:[#allocation2 + $0x270] sm:$0xf]  ;;  %v2804_v39 = vld [vmem:[#allocation2 + $0x260] sm:$0xf] }
 0x74f   :  { %1799 = vmatpush.bf16.msrb.mxu3 %v3620_v8  ;;  %1828 = vmatpush.bf16.msra.mxu2 %v3622_v45  ;;  %v3041_v27 = vld [vmem:[#allocation2 + $0x264] sm:$0xf0]  ;;  %v3040_v13 = vld [vmem:[#allocation2 + $0x254] sm:$0xf0]  ;;  %v2796_v44 = vld [vmem:[#allocation2 + $0x240] sm:$0xf] }
 0x750   :  { %2156 = vmatpush.bf16.msrb.mxu0 %v2825_v6  ;;  %v2805_v37 = vor.u32 %v3041_v27, %v2804_v39  ;;  %v3048_v21 = vld [vmem:[#allocation2 + $0x2d4] sm:$0xf0]  ;;  %v2828_v47 = vld [vmem:[#allocation2 + $0x2c0] sm:$0xf] }
 0x753   :  { %1800 = vmatpush.bf16.msrb.mxu3 %v3626_v57  ;;  %1829 = vmatpush.bf16.msra.mxu2 %v3628_v31 }
 0x754   :  { %2157 = vmatpush.bf16.msrb.mxu0 %v2821_v34 }
 0x756   :  { %2786 = vmatmul.msk.bf16.vlgmr.msrb.gmra.mxu3 %vm262_vm5, %v3127_v58  ;;  %2790 = vmatmul.msk.bf16.vlgmr.msra.gmra.mxu2 %vm262_vm5, %v3127_v58  ;;  %v3054_v58 = vld [vmem:[#allocation2 + $0x334] sm:$0xf0] }
 0x757   :  { %2214 = vmatpush.bf16.msra.mxu3 %v2889_v14  ;;  %2243 = vmatpush.bf16.msrb.mxu2 %v2921_v26  ;;  %v2857_v46 = vor.u32 %v3054_v58, %v2856_v7  ;;  %v2852_v14 = vld [vmem:[#allocation2 + $0x320] sm:$0xf]  ;;  %v2848_v26 = vld [vmem:[#allocation2 + $0x310] sm:$0xf] }
 0x759   :  { %2185 = vmatpush.bf16.msrb.mxu1 %v2857_v46 }
 0x75b   :  { %2215 = vmatpush.bf16.msra.mxu3 %v2885_v49  ;;  %2244 = vmatpush.bf16.msrb.mxu2 %v2917_v24  ;;  %v3043_v49 = vld [vmem:[#allocation2 + $0x284] sm:$0xf0]  ;;  %v2844_v24 = vld [vmem:[#allocation2 + $0x300] sm:$0xf] }
 0x75c   :  { %v2813_v48 = vor.u32 %v3043_v49, %v2812_v18  ;;  %v2845_v50 = vor.u32 %v3051_v23, %v2844_v24 }
 0x75f   :  { %2216 = vmatpush.bf16.msra.mxu3 %v2881_v22  ;;  %2245 = vmatpush.bf16.msrb.mxu2 %v2913_v28  ;;  %v3042_v22 = vld [vmem:[#allocation2 + $0x274] sm:$0xf0]  ;;  %v2840_v28 = vld [vmem:[#allocation2 + $0x2f0] sm:$0xf] }
 0x760   :  { %v2809_v20 = vor.u32 %v3042_v22, %v2808_v25 }
 0x763   :  { %2217 = vmatpush.bf16.msra.mxu3 %v2877_v61  ;;  %2246 = vmatpush.bf16.msrb.mxu2 %v2909_v32  ;;  %v2841_v61 = vor.u32 %v3050_v51, %v2840_v28  ;;  %v2836_v32 = vld [vmem:[#allocation2 + $0x2e0] sm:$0xf] }
 0x766   :  { %2787 = vmatmul.msk.bf16.gmra.mxu3 %vm262_vm5, %v3128_v59  ;;  %2791 = vmatmul.msk.bf16.gmra.mxu2 %vm262_vm5, %v3128_v59  ;;  %v3049_v59 = vld [vmem:[#allocation2 + $0x2e4] sm:$0xf0] }
 0x767   :  { %2218 = vmatpush.bf16.msra.mxu3 %v2873_v12  ;;  %2247 = vmatpush.bf16.msrb.mxu2 %v2905_v5  ;;  %v2837_v15 = vor.u32 %v3049_v59, %v2836_v32  ;;  %v3039_v5 = vld [vmem:[#allocation2 + $0x244] sm:$0xf0]  ;;  %v2928_v32 = vld [vmem:[#allocation2 + $0x450] sm:$0xf]  ;;  %v3072_v59 = vld [vmem:[#allocation2 + $0x454] sm:$0xf0] }
 0x768   :  { %v2797_v54 = vor.u32 %v3039_v5, %v2796_v44 }
 0x76b   :  { %2219 = vmatpush.bf16.msra.mxu3 %v2869_v55  ;;  %2248 = vmatpush.bf16.msrb.mxu2 %v2901_v52  ;;  %v3047_v55 = vld [vmem:[#allocation2 + $0x2c4] sm:$0xf0] }
 0x76c   :  { %v2829_v56 = vor.u32 %v3047_v55, %v2828_v47 }
 0x76f   :  { %2220 = vmatpush.bf16.msra.mxu3 %v2865_v60  ;;  %2249 = vmatpush.bf16.msrb.mxu2 %v2897_v62 }
 0x773   :  { %2221 = vmatpush.bf16.msra.mxu3 %v2861_v2  ;;  %2250 = vmatpush.bf16.msrb.mxu2 %v2893_v3 }
 0x776   :  { %2788 = vmatmul.msk.bf16.gmra.mxu3 %vm262_vm5, %v3129_v63  ;;  %2792 = vmatmul.msk.bf16.gmra.mxu2 %vm262_vm5, %v3129_v63 }
 0x786   :  { %2789 = vmatmul.msk.bf16.gmra.mxu3 %vm262_vm5, %v3130_v17  ;;  %2793 = vmatmul.msk.bf16.gmra.mxu2 %vm262_vm5, %v3130_v17 }
 0x796   :  { %2222 = vmatmul.bf16.vlgmr.msra.gmra.mxu3 %v3626_v57  ;;  %2251 = vmatmul.bf16.vlgmr.msrb.gmra.mxu2 %v3628_v31  ;;  %v2853_v57 = vor.u32 %v3053_v29, %v2852_v14  ;;  %v3044_v31 = vld [vmem:[#allocation2 + $0x294] sm:$0xf0] }
 0x798   :  { %2186 = vmatpush.bf16.msrb.mxu1 %v2853_v57 }
 0x7a6   :  { %2227 = vmatmul.bf16.gmra.mxu3 %v3620_v8  ;;  %2256 = vmatmul.bf16.gmra.mxu2 %v3622_v45  ;;  %v3052_v8 = vld [vmem:[#allocation2 + $0x314] sm:$0xf0]  ;;  %v2817_v45 = vor.u32 %v3044_v31, %v2816_v30 }
 0x7a7   :  { %v2849_v16 = vor.u32 %v3052_v8, %v2848_v26 }
 0x7a8   :  { %2158 = vmatpush.bf16.msrb.mxu0 %v2817_v45 }
 0x7a9   :  { %2187 = vmatpush.bf16.msrb.mxu1 %v2849_v16 }
 0x7ac   :  { %2159 = vmatpush.bf16.msrb.mxu0 %v2813_v48 }
 0x7ad   :  { %2188 = vmatpush.bf16.msrb.mxu1 %v2845_v50 }
 0x7b0   :  { %2160 = vmatpush.bf16.msrb.mxu0 %v2809_v20 }
 0x7b1   :  { %2189 = vmatpush.bf16.msrb.mxu1 %v2841_v61 }
 0x7b4   :  { %2161 = vmatpush.bf16.msrb.mxu0 %v2805_v37  ;;  %v2929_v37 = vor.u32 %v3072_v59, %v2928_v32  ;;  %v3077_v32 = vld [vmem:[#allocation2 + $0x4a4] sm:$0xf0] }
 0x7b5   :  { %2190 = vmatpush.bf16.msrb.mxu1 %v2837_v15  ;;  %v2924_v15 = vld [vmem:[#allocation2 + $0x440] sm:$0xf] }
 0x7b6   :  { %2232 = vmatmul.bf16.gmra.mxu3 %v3614_v43  ;;  %2261 = vmatmul.bf16.gmra.mxu2 %v3616_v4  ;;  %v2800_v43 = vld [vmem:[#allocation2 + $0x250] sm:$0xf] }
 0x7b7   :  { %v2832_v4 = vld [vmem:[#allocation2 + $0x2d0] sm:$0xf]  ;;  %v2801_v12 = vor.u32 %v3040_v13, %v2800_v43  ;;  %v3071_v43 = vld [vmem:[#allocation2 + $0x444] sm:$0xf0] }
 0x7b8   :  { %v2833_v11 = vor.u32 %v3048_v21, %v2832_v4  ;;  %v2925_v13 = vor.u32 %v3071_v43, %v2924_v15 }
 0x7b9   :  { %2162 = vmatpush.bf16.msrb.mxu0 %v2801_v12 }
 0x7ba   :  { %2191 = vmatpush.bf16.msrb.mxu1 %v2833_v11  ;;  %v3660_v11 = vld [vmem:[#allocation4 + $0x4] ss:$0 sm:$0xff] }
 0x7bd   :  { %2163 = vmatpush.bf16.msrb.mxu0 %v2797_v54 }
 0x7be   :  { %2192 = vmatpush.bf16.msrb.mxu1 %v2829_v56 }
 0x7c1   :  { %2311 = vmatpush.bf16.msra.mxu0 %v2929_v37 }
 0x7c5   :  { %2312 = vmatpush.bf16.msra.mxu0 %v2925_v13 }
 0x7c6   :  { %2237 = vmatmul.bf16.gmra.mxu3 %v3608_v1  ;;  %2266 = vmatmul.bf16.gmra.mxu2 %v3610_v42 }
 0x7d9   :  { %v1802_v33 = vpop.f32.mrf.mxu3  ;;  %v1831_v52 = vpop.f32.mrf.mxu2 }
 0x7da   :  { %v1851_v38 = vpack.c.bf16 %v1831_v52, %v1802_v33 }
 0x7dc   :  { %v1867_v19 = vunpack.c.l.b16 %v1851_v38  ;;  %v1868_v1 = vunpack.c.h.b16 %v1851_v38 }
 0x7e1   :  { %v1804_v40 = vpop.f32.mrf.mxu3  ;;  %v1833_v60 = vpop.f32.mrf.mxu2 }
 0x7e2   :  { %v1852_v53 = vpack.c.bf16 %v1833_v60, %v1804_v40 }
 0x7e4   :  { %v1869_v62 = vunpack.c.l.b16 %v1852_v53  ;;  %v1870_v42 = vunpack.c.h.b16 %v1852_v53 }
 0x7e6   :  { %v1883_v41 = vpack.c.b16 %v1869_v62, %v1867_v19  ;;  %v1884_v9 = vpack.c.b16 %v1870_v42, %v1868_v1 }
 0x7e8   :  { %2164 = vmatmul.bf16.vlgmr.msrb.gmra.mxu0 %v1883_v41  ;;  %2193 = vmatmul.bf16.vlgmr.msrb.gmra.mxu1 %v1884_v9 }
 0x7e9   :  { %v1807_v2 = vpop.f32.mrf.mxu3  ;;  %v1836_v3 = vpop.f32.mrf.mxu2 }
 0x7ea   :  { %v1853_v63 = vpack.c.bf16 %v1836_v3, %v1807_v2 }
 0x7ec   :  { %v1871_v7 = vunpack.c.l.b16 %v1853_v63  ;;  %v1872_v6 = vunpack.c.h.b16 %v1853_v63 }
 0x7f1   :  { %v1809_v17 = vpop.f32.mrf.mxu3  ;;  %v1838_v35 = vpop.f32.mrf.mxu2 }
 0x7f2   :  { %v1854_v10 = vpack.c.bf16 %v1838_v35, %v1809_v17 }
 0x7f4   :  { %v1873_v58 = vunpack.c.l.b16 %v1854_v10  ;;  %v1874_v36 = vunpack.c.h.b16 %v1854_v10 }
 0x7f6   :  { %v1885_v0 = vpack.c.b16 %v1873_v58, %v1871_v7  ;;  %v1886_v46 = vpack.c.b16 %v1874_v36, %v1872_v6 }
 0x7f8   :  { %2169 = vmatmul.bf16.gmra.mxu0 %v1885_v0  ;;  %2198 = vmatmul.bf16.gmra.mxu1 %v1886_v46 }
 0x7f9   :  { %v1812_v14 = vpop.f32.mrf.mxu3  ;;  %v1841_v29 = vpop.f32.mrf.mxu2 }
 0x7fa   :  { %v1855_v34 = vpack.c.bf16 %v1841_v29, %v1812_v14 }
 0x7fc   :  { %v1875_v26 = vunpack.c.l.b16 %v1855_v34  ;;  %v1876_v8 = vunpack.c.h.b16 %v1855_v34 }
 0x801   :  { %v1814_v57 = vpop.f32.mrf.mxu3  ;;  %v1843_v30 = vpop.f32.mrf.mxu2 }
 0x802   :  { %v1856_v31 = vpack.c.bf16 %v1843_v30, %v1814_v57 }
 0x804   :  { %v1877_v45 = vunpack.c.l.b16 %v1856_v31  ;;  %v1878_v16 = vunpack.c.h.b16 %v1856_v31 }
 0x806   :  { %v1887_v18 = vpack.c.b16 %v1877_v45, %v1875_v26  ;;  %v1888_v49 = vpack.c.b16 %v1878_v16, %v1876_v8  ;;  %v2964_v26 = vld [vmem:[#allocation2 + $0x4d0] sm:$0xf]  ;;  %v3080_v8 = vld [vmem:[#allocation2 + $0x4d4] sm:$0xf0]  ;;  %v2960_v45 = vld [vmem:[#allocation2 + $0x4c0] sm:$0xf] }
 0x807   :  { %v2965_v16 = vor.u32 %v3080_v8, %v2964_v26 }
 0x808   :  { %2174 = vmatmul.bf16.gmra.mxu0 %v1887_v18  ;;  %2203 = vmatmul.bf16.gmra.mxu1 %v1888_v49  ;;  %v3079_v18 = vld [vmem:[#allocation2 + $0x4c4] sm:$0xf0] }
 0x809   :  { %v1817_v24 = vpop.f32.mrf.mxu3  ;;  %v1846_v23 = vpop.f32.mrf.mxu2  ;;  %2411 = vmatpush.bf16.msra.mxu1 %v2965_v16  ;;  %v2961_v49 = vor.u32 %v3079_v18, %v2960_v45 }
 0x80a   :  { %v1857_v48 = vpack.c.bf16 %v1846_v23, %v1817_v24 }
 0x80c   :  { %v1879_v28 = vunpack.c.l.b16 %v1857_v48  ;;  %v1880_v20 = vunpack.c.h.b16 %v1857_v48  ;;  %v2956_v48 = vld [vmem:[#allocation2 + $0x4b0] sm:$0xf] }
 0x80d   :  { %2412 = vmatpush.bf16.msra.mxu1 %v2961_v49 }
 0x811   :  { %v1819_v50 = vpop.f32.mrf.mxu3  ;;  %v1848_v25 = vpop.f32.mrf.mxu2 }
 0x812   :  { %v1858_v22 = vpack.c.bf16 %v1848_v25, %v1819_v50  ;;  %v3078_v50 = vld [vmem:[#allocation2 + $0x4b4] sm:$0xf0] }
 0x814   :  { %v1881_v51 = vunpack.c.l.b16 %v1858_v22  ;;  %v1882_v39 = vunpack.c.h.b16 %v1858_v22 }
 0x816   :  { %v1889_v27 = vpack.c.b16 %v1881_v51, %v1879_v28  ;;  %v1890_v61 = vpack.c.b16 %v1882_v39, %v1880_v20  ;;  %v2957_v51 = vor.u32 %v3078_v50, %v2956_v48 }
 0x818   :  { %2179 = vmatmul.bf16.gmra.mxu0 %v1889_v27  ;;  %2208 = vmatmul.bf16.gmra.mxu1 %v1890_v61  ;;  %v2952_v61 = vld [vmem:[#allocation2 + $0x4a0] sm:$0xf] }
 0x819   :  { %v2223_v4 = vpop.f32.mrf.mxu3  ;;  %v2252_v12 = vpop.f32.mrf.mxu2  ;;  %2413 = vmatpush.bf16.msra.mxu1 %v2957_v51  ;;  %v2953_v37 = vor.u32 %v3077_v32, %v2952_v61  ;;  %v2362_v32 = vld [vmem:[#allocation4 + $0x6] ss:$0 sm:$0xff] }
 0x81d   :  { %2414 = vmatpush.bf16.msra.mxu1 %v2953_v37 }
 0x821   :  { %v2225_v21 = vpop.f32.mrf.mxu3  ;;  %v2254_v47 = vpop.f32.mrf.mxu2 }
 0x829   :  { %v2228_v52 = vpop.f32.mrf.mxu3  ;;  %v2257_v40 = vpop.f32.mrf.mxu2 }
 0x831   :  { %v2230_v2 = vpop.f32.mrf.mxu3  ;;  %v2259_v63 = vpop.f32.mrf.mxu2 }
 0x839   :  { %v2233_v36 = vpop.f32.mrf.mxu3  ;;  %v2262_v46 = vpop.f32.mrf.mxu2 }
 0x841   :  { %v2235_v24 = vpop.f32.mrf.mxu3  ;;  %v2264_v20 = vpop.f32.mrf.mxu2 }
 0x865   :  { %v2165_v44 = vpop.f32.mrf.mxu0  ;;  %v2194_v5 = vpop.f32.mrf.mxu1 }
 0x866   :  { %v2166_v54 = vadd.f32 %v2165_v44, %v3660_v11 }
 0x868   :  { %v2195_v55 = vadd.f32 %v2194_v5, %v2166_v54  ;;  %v2267_v5 = vpop.f32.mrf.mxu2 }
 0x86a   :  { %v2224_v60 = vadd.f32 %v2223_v4, %v2195_v55 }
 0x86c   :  { %v2253_v1 = vadd.f32 %v2252_v12, %v2224_v60 }
 0x86d   :  { %v2167_v56 = vpop.f32.mrf.mxu0  ;;  %v2196_v33 = vpop.f32.mrf.mxu1 }
 0x86e   :  { %v2168_v38 = vadd.f32 %v2167_v56, %v3660_v11 }
 0x870   :  { %v2197_v53 = vadd.f32 %v2196_v33, %v2168_v38  ;;  %v2269_v60 = vpop.f32.mrf.mxu2 }
 0x872   :  { %v2226_v19 = vadd.f32 %v2225_v21, %v2197_v53  ;;  %v2238_v21 = vpop.f32.mrf.mxu3 }
 0x874   :  { %v2255_v62 = vadd.f32 %v2254_v47, %v2226_v19 }
 0x875   :  { %v2170_v42 = vpop.f32.mrf.mxu0  ;;  %v2199_v41 = vpop.f32.mrf.mxu1 }
 0x876   :  { %v2272_v9 = vpack.c.bf16 %v2255_v62, %v2253_v1  ;;  %v2171_v3 = vadd.f32 %v2170_v42, %v3660_v11  ;;  %v2948_v62 = vld [vmem:[#allocation2 + $0x490] sm:$0xf]  ;;  %v3076_v42 = vld [vmem:[#allocation2 + $0x494] sm:$0xf0] }
 0x878   :  { %2930 = vmatmul.msk.bf16.vlgmr.msra.gmra.mxu0 %vm637_vm10, %v2272_v9  ;;  %v2200_v17 = vadd.f32 %v2199_v41, %v2171_v3  ;;  %v2949_v41 = vor.u32 %v3076_v42, %v2948_v62  ;;  %v2944_v9 = vld [vmem:[#allocation2 + $0x480] sm:$0xf] }
 0x87a   :  { %v2229_v6 = vadd.f32 %v2228_v52, %v2200_v17  ;;  %v2240_v38 = vpop.f32.mrf.mxu3  ;;  %2415 = vmatpush.bf16.msra.mxu1 %v2949_v41 }
 0x87c   :  { %v2258_v14 = vadd.f32 %v2257_v40, %v2229_v6 }
 0x87d   :  { %v2172_v35 = vpop.f32.mrf.mxu0  ;;  %v2201_v10 = vpop.f32.mrf.mxu1 }
 0x87e   :  { %v2173_v7 = vadd.f32 %v2172_v35, %v3660_v11  ;;  %v2936_v35 = vld [vmem:[#allocation2 + $0x460] sm:$0xf] }
 0x880   :  { %v2202_v58 = vadd.f32 %v2201_v10, %v2173_v7  ;;  %v3073_v10 = vld [vmem:[#allocation2 + $0x464] sm:$0xf0] }
 0x881   :  { %v2937_v7 = vor.u32 %v3073_v10, %v2936_v35 }
 0x882   :  { %v2231_v0 = vadd.f32 %v2230_v2, %v2202_v58  ;;  %v3075_v2 = vld [vmem:[#allocation2 + $0x484] sm:$0xf0]  ;;  %v2280_v58 = vld [vmem:[#allocation4 + $0x5] ss:$0 sm:$0xff] }
 0x883   :  { %v2945_v3 = vor.u32 %v3075_v2, %v2944_v9 }
 0x884   :  { %v2260_v29 = vadd.f32 %v2259_v63, %v2231_v0  ;;  %v3074_v63 = vld [vmem:[#allocation2 + $0x474] sm:$0xf0] }
 0x885   :  { %v2175_v34 = vpop.f32.mrf.mxu0  ;;  %v2204_v57 = vpop.f32.mrf.mxu1  ;;  %2416 = vmatpush.bf16.msra.mxu1 %v2945_v3 }
 0x886   :  { %v2273_v30 = vpack.c.bf16 %v2260_v29, %v2258_v14  ;;  %v2176_v31 = vadd.f32 %v2175_v34, %v3660_v11 }
 0x888   :  { %2931 = vmatmul.msk.bf16.gmra.mxu0 %vm637_vm10, %v2273_v30  ;;  %v2205_v23 = vadd.f32 %v2204_v57, %v2176_v31 }
 0x88a   :  { %v2234_v39 = vadd.f32 %v2233_v36, %v2205_v23 }
 0x88c   :  { %v2263_v15 = vadd.f32 %v2262_v46, %v2234_v39 }
 0x88d   :  { %v2177_v25 = vpop.f32.mrf.mxu0  ;;  %v2206_v22 = vpop.f32.mrf.mxu1 }
 0x88e   :  { %v2178_v28 = vadd.f32 %v2177_v25, %v3660_v11 }
 0x890   :  { %v2207_v27 = vadd.f32 %v2206_v22, %v2178_v28 }
 0x892   :  { %v2236_v59 = vadd.f32 %v2235_v24, %v2207_v27 }
 0x894   :  { %v2265_v43 = vadd.f32 %v2264_v20, %v2236_v59 }
 0x895   :  { %v2180_v13 = vpop.f32.mrf.mxu0  ;;  %v2209_v4 = vpop.f32.mrf.mxu1 }
 0x896   :  { %v2274_v12 = vpack.c.bf16 %v2265_v43, %v2263_v15  ;;  %v2181_v44 = vadd.f32 %v2180_v13, %v3660_v11 }
 0x898   :  { %2932 = vmatmul.msk.bf16.gmra.mxu0 %vm637_vm10, %v2274_v12  ;;  %v2210_v47 = vadd.f32 %v2209_v4, %v2181_v44 }
 0x89a   :  { %v2239_v33 = vadd.f32 %v2238_v21, %v2210_v47 }
 0x89c   :  { %v2268_v53 = vadd.f32 %v2267_v5, %v2239_v33 }
 0x89d   :  { %v2182_v54 = vpop.f32.mrf.mxu0  ;;  %v2211_v56 = vpop.f32.mrf.mxu1 }
 0x89e   :  { %v2183_v55 = vadd.f32 %v2182_v54, %v3660_v11  ;;  %v2940_v11 = vld [vmem:[#allocation2 + $0x470] sm:$0xf] }
 0x89f   :  { %v2941_v17 = vor.u32 %v3074_v63, %v2940_v11 }
 0x8a0   :  { %v2212_v52 = vadd.f32 %v2211_v56, %v2183_v55 }
 0x8a1   :  { %2417 = vmatpush.bf16.msra.mxu1 %v2941_v17 }
 0x8a2   :  { %v2241_v40 = vadd.f32 %v2240_v38, %v2212_v52 }
 0x8a4   :  { %v2270_v19 = vadd.f32 %v2269_v60, %v2241_v40 }
 0x8a5   :  { %2418 = vmatpush.bf16.msra.mxu1 %v2937_v7 }
 0x8a6   :  { %v2275_v1 = vpack.c.bf16 %v2270_v19, %v2268_v53 }
 0x8a8   :  { %2933 = vmatmul.msk.bf16.gmra.mxu0 %vm637_vm10, %v2275_v1 }
 0x8f5   :  { %v2314_v6 = vpop.f32.mrf.mxu0 }
 0x8f6   :  { %v2315_v36 = vadd.f32 %v2314_v6, %v2280_v58 }
 0x8f8   :  { %v2334_v14 = vmax.f32 %v2315_v36, 0.0 }
 0x8fd   :  { %v2316_v0 = vpop.f32.mrf.mxu0 }
 0x8fe   :  { %v2317_v46 = vadd.f32 %v2316_v0, %v2280_v58 }
 0x900   :  { %v2335_v29 = vmax.f32 %v2317_v46, 0.0 }
 0x902   :  { %v2342_v34 = vpack.c.bf16 %v2335_v29, %v2334_v14 }
 0x904   :  { %2419 = vmatmul.bf16.vlgmr.msra.gmra.mxu1 %v2342_v34 }
 0x905   :  { %v2319_v57 = vpop.f32.mrf.mxu0 }
 0x906   :  { %v2320_v30 = vadd.f32 %v2319_v57, %v2280_v58 }
 0x908   :  { %v2336_v8 = vmax.f32 %v2320_v30, 0.0 }
 0x90d   :  { %v2321_v31 = vpop.f32.mrf.mxu0 }
 0x90e   :  { %v2322_v26 = vadd.f32 %v2321_v31, %v2280_v58 }
 0x910   :  { %v2337_v45 = vmax.f32 %v2322_v26, 0.0 }
 0x912   :  { %v2343_v16 = vpack.c.bf16 %v2337_v45, %v2336_v8 }
 0x914   :  { %2424 = vmatmul.bf16.gmra.mxu1 %v2343_v16 }
 0x915   :  { %v2324_v18 = vpop.f32.mrf.mxu0 }
 0x916   :  { %v2325_v49 = vadd.f32 %v2324_v18, %v2280_v58 }
 0x918   :  { %v2338_v48 = vmax.f32 %v2325_v49, 0.0 }
 0x91d   :  { %v2326_v24 = vpop.f32.mrf.mxu0 }
 0x91e   :  { %v2327_v23 = vadd.f32 %v2326_v24, %v2280_v58 }
 0x920   :  { %v2339_v50 = vmax.f32 %v2327_v23, 0.0 }
 0x922   :  { %v2344_v25 = vpack.c.bf16 %v2339_v50, %v2338_v48 }
 0x924   :  { %2429 = vmatmul.bf16.gmra.mxu1 %v2344_v25 }
 0x925   :  { %v2329_v22 = vpop.f32.mrf.mxu0 }
 0x926   :  { %v2330_v28 = vadd.f32 %v2329_v22, %v2280_v58 }
 0x928   :  { %v2340_v39 = vmax.f32 %v2330_v28, 0.0 }
 0x92d   :  { %v2331_v20 = vpop.f32.mrf.mxu0 }
 0x92e   :  { %v2332_v51 = vadd.f32 %v2331_v20, %v2280_v58 }
 0x930   :  { %v2341_v27 = vmax.f32 %v2332_v51, 0.0 }
 0x932   :  { %v2345_v61 = vpack.c.bf16 %v2341_v27, %v2340_v39 }
 0x934   :  { %2434 = vmatmul.bf16.gmra.mxu1 %v2345_v61 }
 0x981   :  { %v2420_v59 = vpop.f32.mrf.mxu1 }
 0x982   :  { %v2421_v37 = vadd.f32 %v2420_v59, %v2362_v32 }
 0x984   :  { %2440 = vst [vmem:[%s3702_s4] sm:$0xff] %v2421_v37 }
 0x989   :  { %v2422_v15 = vpop.f32.mrf.mxu1 }
 0x98a   :  { %v2423_v43 = vadd.f32 %v2422_v15, %v2362_v32 }
 0x98c   :  { %2441 = vst [vmem:[%s3702_s4 + $0x8] sm:$0xff] %v2423_v43 }
 0x991   :  { %v2425_v13 = vpop.f32.mrf.mxu1 }
 0x992   :  { %v2426_v4 = vadd.f32 %v2425_v13, %v2362_v32 }
 0x994   :  { %2442 = vst [vmem:[%s3702_s4 + $0x10] sm:$0xff] %v2426_v4 }
 0x999   :  { %v2427_v12 = vpop.f32.mrf.mxu1 }
 0x99a   :  { %v2428_v21 = vadd.f32 %v2427_v12, %v2362_v32 }
 0x99c   :  { %2443 = vst [vmem:[%s3702_s4 + $0x18] sm:$0xff] %v2428_v21 }
 0x9a1   :  { %v2430_v44 = vpop.f32.mrf.mxu1 }
 0x9a2   :  { %v2431_v5 = vadd.f32 %v2430_v44, %v2362_v32 }
 0x9a4   :  { %2444 = vst [vmem:[%s3702_s4 + $0x20] sm:$0xff] %v2431_v5 }
 0x9a9   :  { %v2432_v47 = vpop.f32.mrf.mxu1 }
 0x9aa   :  { %v2433_v54 = vadd.f32 %v2432_v47, %v2362_v32 }
 0x9ac   :  { %2445 = vst [vmem:[%s3702_s4 + $0x28] sm:$0xff] %v2433_v54 }
 0x9b1   :  { %v2435_v55 = vpop.f32.mrf.mxu1 }
 0x9b2   :  { %v2436_v56 = vadd.f32 %v2435_v55, %v2362_v32 }
 0x9b4   :  { %2446 = vst [vmem:[%s3702_s4 + $0x30] sm:$0xff] %v2436_v56 }
 0x9b9   :  { %v2437_v33 = vpop.f32.mrf.mxu1 }
 0x9ba   :  { %v2438_v52 = vadd.f32 %v2437_v33, %v2362_v32 }
 0x9bc   :  { %2447 = vst [vmem:[%s3702_s4 + $0x38] sm:$0xff] %v2438_v52 }
 0x9bd   :  { %2452 = vsyncpa [#allocation3], 1 }
 0x9be   :  { %2453 = vsyncpa [#allocation5], 1 }

</bundles_post_ra>
